<compile_context>
chip_gen: v7x
topology: tpu7x:2x2x1
jax: 0.10.0
libtpu: 0.0.40
codegen_flags: <defaults>
</compile_context>

<pallas_src>
import math

import jax
import jax.numpy as jnp
from jax import lax
from jax.experimental import pallas as pl
from jax.experimental.pallas import tpu as pltpu

# ----------------------------- model constants -----------------------------
B = 2          # batch
S = 32         # sequence length (N in the PyTorch script)
D = 32         # embedding_dim
H = 2          # heads
DH = D // H    # attention_head_dim = 16
HID = 2 * D    # FFN hidden_dim = 64
EPS = 1e-12    # LayerNorm eps from the PyTorch module


def _norm(x):
    """LayerNorm without affine (affine folded into downstream weights)."""
    mu = jnp.mean(x, axis=-1, keepdims=True)
    var = jnp.mean((x - mu) ** 2, axis=-1, keepdims=True)
    return (x - mu) * lax.rsqrt(var + EPS)


# ------------------------------- the kernel --------------------------------
def kernel(x_ref, mask_ref, bias_ref, wslab_ref, w2_ref, out_ref):
    # ---- unpack constants (static in-tile slices; cheap) ----
    x = x_ref[...].astype(jnp.float32).reshape(B * S, D)     # (64, 32)
    mask = mask_ref[...]                                      # (S, S) f32 additive
    biases = bias_ref[...]                                    # (4, 96) f32
    bqkv = biases[0:1, :]                                     # (1, 96)
    b1 = biases[1:2, 0:HID]                                   # (1, 64)
    b_out = biases[2:3, 0:D]                                  # (1, 32)
    b2 = biases[3:4, 0:D]                                     # (1, 32)
    slab = wslab_ref[...]                                     # (32, 192) bf16
    wqkv = slab[:, 0:3 * D]                                   # (32, 96)
    wo = slab[:, 3 * D:4 * D]                                 # (32, 32)
    w1 = slab[:, 4 * D:4 * D + HID]                           # (32, 64)
    w2 = w2_ref[...]                                          # (64, 32) bf16

    # ---- layernorm1 (affine folded) + fused QKV projection ----
    h1 = _norm(x).astype(jnp.bfloat16)                        # (64, 32)
    qkv = jnp.dot(h1, wqkv, preferred_element_type=jnp.float32) + bqkv
    qkv = qkv.astype(jnp.bfloat16)                            # (64, 96)

    # ---- attention core: only scores / p@v stay per (batch, head) ----
    rows = []
    for b in range(B):                                        # static unroll (2)
        r0 = b * S
        heads = []
        for hd in range(H):                                   # static unroll (2)
            q = qkv[r0:r0 + S, hd * DH:(hd + 1) * DH]                 # (S, DH)
            k = qkv[r0:r0 + S, D + hd * DH:D + (hd + 1) * DH]         # (S, DH)
            v = qkv[r0:r0 + S, 2 * D + hd * DH:2 * D + (hd + 1) * DH] # (S, DH)

            s = lax.dot_general(q, k, (((1,), (1,)), ((), ())),
                                preferred_element_type=jnp.float32)    # (S, S)
            s = s + mask
            m = jnp.max(s, axis=-1, keepdims=True)
            e = jnp.exp(s - m)
            p = e * pl.reciprocal(jnp.sum(e, axis=-1, keepdims=True), approx=True)

            heads.append(jnp.dot(p.astype(jnp.bfloat16), v,
                                 preferred_element_type=jnp.float32))   # (S, DH)
        rows.append(jnp.concatenate(heads, axis=-1))          # (S, D)
    pv_all = jnp.concatenate(rows, axis=0).astype(jnp.bfloat16)  # (B*S, D)

    # ---- fused output projection (+ folded bv@Wo + bo); residual ----
    attn = jnp.dot(pv_all, wo, preferred_element_type=jnp.float32) + b_out
    x2 = x + attn                                             # dropout1 = identity

    # ---- layernorm2 (affine folded) + FFN; residual ----
    h2 = _norm(x2).astype(jnp.bfloat16)
    f = jnp.dot(h2, w1, preferred_element_type=jnp.float32) + b1
    f = jax.nn.gelu(f, approximate=True)
    f = jnp.dot(f.astype(jnp.bfloat16), w2, preferred_element_type=jnp.float32) + b2
    y = x2 + f                                                # dropout2 = identity

    out_ref[...] = y.reshape(B, S, D).astype(out_ref.dtype)


# ------------------------------ the wrapper ---------------------------------
@jax.jit
def transformer_block(x, mask, packed):
    biases, wslab, w2 = packed
    Bx, Sx, Dx = x.shape

    in_specs = [
        pl.BlockSpec((Bx, Sx, Dx), lambda i: (0, 0, 0)),
        pl.BlockSpec(mask.shape, lambda i: (0, 0)),
        pl.BlockSpec(biases.shape, lambda i: (0, 0)),
        pl.BlockSpec(wslab.shape, lambda i: (0, 0)),
        pl.BlockSpec(w2.shape, lambda i: (0, 0)),
    ]

    flops = (2 * Bx * Sx * Dx * 3 * Dx            # fused QKV projection
             + Bx * H * 2 * 2 * Sx * Sx * DH      # scores + p@v
             + 2 * Bx * Sx * Dx * Dx              # fused output projection
             + 2 * 2 * Bx * Sx * Dx * HID)        # FFN
    transcendentals = Bx * H * Sx * Sx + Bx * Sx * HID
    nbytes = lambda a: a.size * a.dtype.itemsize
    bytes_accessed = 2 * nbytes(x) + nbytes(mask) + sum(nbytes(p) for p in packed)

    return pl.pallas_call(
        kernel,
        out_shape=jax.ShapeDtypeStruct((Bx, Sx, Dx), x.dtype),
        grid_spec=pltpu.PrefetchScalarGridSpec(
            num_scalar_prefetch=0,
            grid=(1,),
            in_specs=in_specs,
            out_specs=pl.BlockSpec((Bx, Sx, Dx), lambda i: (0, 0, 0)),
        ),
        compiler_params=pltpu.CompilerParams(
            dimension_semantics=("arbitrary",)),
        cost_estimate=pl.CostEstimate(
            flops=flops, transcendentals=transcendentals,
            bytes_accessed=bytes_accessed),
    )(x, mask, biases, wslab, w2)


# ----------------------------- params & packing -----------------------------
def init_params(key):
    ks = jax.random.split(key, 12)
    w = lambda k, shape: (0.05 * jax.random.normal(k, shape)).astype(jnp.float32)
    return (
        jnp.ones((1, D), jnp.float32),   # ln1 gamma
        jnp.zeros((1, D), jnp.float32),  # ln1 beta
        w(ks[0], (D, D)), w(ks[6], (1, D)),      # Wq, bq
        w(ks[1], (D, D)), w(ks[7], (1, D)),      # Wk, bk
        w(ks[2], (D, D)), w(ks[8], (1, D)),      # Wv, bv
        w(ks[3], (D, D)), w(ks[9], (1, D)),      # Wo, bo
        jnp.ones((1, D), jnp.float32),   # ln2 gamma
        jnp.zeros((1, D), jnp.float32),  # ln2 beta
        w(ks[4], (D, HID)), w(ks[10], (1, HID)),  # W1, b1
        w(ks[5], (HID, D)), w(ks[11], (1, D)),    # W2, b2
    )


def pack_params(raw):
    (ln1g, ln1b, wq, bq, wk, bk, wv, bv, wo, bo,
     ln2g, ln2b, w1, b1, w2, b2) = raw
    scale = 1.0 / math.sqrt(DH)

    # Fold LayerNorm1 affine + score scale into the fused QKV weight/bias.
    g1 = ln1g.reshape(D, 1)
    wq_f = g1 * wq * scale
    wk_f = g1 * wk
    wv_f = g1 * wv
    bq_f = (bq + ln1b @ wq) * scale
    bk_f = bk + ln1b @ wk
    bv_f = bv + ln1b @ wv                      # moved past attention (rows of p sum ~1)
    wqkv = jnp.concatenate([wq_f, wk_f, wv_f], axis=1)        # (D, 3D)
    bqkv = jnp.concatenate([bq_f, bk_f, jnp.zeros_like(bv)], axis=1)  # (1, 3D)

    bias_out = bv_f @ wo + bo                  # (1, D), applied after fused Wo

    # Fold LayerNorm2 affine into W1 / b1.
    w1_f = ln2g.reshape(D, 1) * w1
    b1_f = b1 + ln2b @ w1                      # (1, HID)

    def padrow(v, width=3 * D):
        return jnp.pad(v, ((0, 0), (0, width - v.shape[1])))

    biases = jnp.concatenate(
        [bqkv, padrow(b1_f), padrow(bias_out), padrow(b2)], axis=0
    ).astype(jnp.float32)                                      # (4, 96)

    wslab = jnp.concatenate([wqkv, wo, w1_f], axis=1).astype(jnp.bfloat16)  # (32, 192)
    w2_bf = w2.astype(jnp.bfloat16)                                          # (64, 32)
    return (biases, wslab, w2_bf)


# -------------------------- pure-JAX reference ------------------------------
def transformer_block_ref(x, mask, raw):
    (ln1g, ln1b, wq, bq, wk, bk, wv, bv, wo, bo,
     ln2g, ln2b, w1, b1, w2, b2) = raw

    def ln(v, g, b_):
        mu = v.mean(-1, keepdims=True)
        var = ((v - mu) ** 2).mean(-1, keepdims=True)
        return (v - mu) * lax.rsqrt(var + EPS) * g + b_

    h = ln(x, ln1g, ln1b)
    q = (h @ wq + bq).reshape(B, S, H, DH)
    k = (h @ wk + bk).reshape(B, S, H, DH)
    v = (h @ wv + bv).reshape(B, S, H, DH)
    s = jnp.einsum("bqhd,bkhd->bhqk", q, k) / math.sqrt(DH) + mask
    p = jax.nn.softmax(s, axis=-1)
    o = jnp.einsum("bhqk,bkhd->bqhd", p, v).reshape(B, S, D)
    o = o @ wo + bo
    x = x + o
    h2 = ln(x, ln2g, ln2b)
    f = jax.nn.gelu(h2 @ w1 + b1, approximate=True)
    f = f @ w2 + b2
    return x + f


# --------------------------------- main --------------------------------------
if __name__ == "__main__":
    key = jax.random.PRNGKey(0)
    kx, km, kp = jax.random.split(key, 3)

    x = jax.random.normal(kx, (B, S, D), dtype=jnp.float32)
    attention_mask = jax.random.randint(km, (S, S), 0, 2).astype(jnp.float32)
    raw = init_params(kp)
    packed = pack_params(raw)

    out = jax.block_until_ready(transformer_block(x, attention_mask, packed))

    ref = transformer_block_ref(x, attention_mask, raw)
    assert out.shape == (B, S, D)
    assert bool(jnp.all(jnp.isfinite(out)))
    max_err = float(jnp.max(jnp.abs(out - ref)))
    assert max_err < 3e-2, f"mismatch vs reference: {max_err}"
    print("KERNEL_OK")
</pallas_src>

<mosaic_0001>
module attributes {stable_mosaic.version = 11 : i64} {
  func.func @kernel(%arg0: i32, %arg1: memref<2x32x32xf32, #tpu.memory_space<vmem>>, %arg2: memref<32x32xf32, #tpu.memory_space<vmem>>, %arg3: memref<4x96xf32, #tpu.memory_space<vmem>>, %arg4: memref<32x192xbf16, #tpu.memory_space<vmem>>, %arg5: memref<64x32xbf16, #tpu.memory_space<vmem>>, %arg6: memref<2x32x32xf32, #tpu.memory_space<vmem>>) attributes {dimension_semantics = [#tpu.dimension_semantics<arbitrary>], iteration_bounds = array<i64: 1>, scalar_prefetch = 0 : i64, scratch_operands = 0 : i64, tpu.core_type = #tpu.core_type<tc>, window_params = [{pipeline_mode = #tpu.pipeline_mode<synchronous>, transform_indices = @transform_0, window_bounds = array<i64: 2, 32, 32>}, {pipeline_mode = #tpu.pipeline_mode<synchronous>, transform_indices = @transform_1, window_bounds = array<i64: 32, 32>}, {pipeline_mode = #tpu.pipeline_mode<synchronous>, transform_indices = @transform_2, window_bounds = array<i64: 4, 96>}, {pipeline_mode = #tpu.pipeline_mode<synchronous>, transform_indices = @transform_3, window_bounds = array<i64: 32, 192>}, {pipeline_mode = #tpu.pipeline_mode<synchronous>, transform_indices = @transform_4, window_bounds = array<i64: 64, 32>}, {pipeline_mode = #tpu.pipeline_mode<synchronous>, transform_indices = @transform_5, window_bounds = array<i64: 2, 32, 32>}]} {
    %c0 = arith.constant 0 : index
    %c0_0 = arith.constant 0 : index
    %c0_1 = arith.constant 0 : index
    %0 = vector.load %arg1[%c0, %c0_0, %c0_1] : memref<2x32x32xf32, #tpu.memory_space<vmem>>, vector<2x32x32xf32>
    %1 = vector.shape_cast %0 : vector<2x32x32xf32> to vector<64x32xf32>
    %c0_2 = arith.constant 0 : index
    %c0_3 = arith.constant 0 : index
    %2 = vector.load %arg2[%c0_2, %c0_3] : memref<32x32xf32, #tpu.memory_space<vmem>>, vector<32x32xf32>
    %c0_4 = arith.constant 0 : index
    %c0_5 = arith.constant 0 : index
    %3 = vector.load %arg3[%c0_4, %c0_5] : memref<4x96xf32, #tpu.memory_space<vmem>>, vector<4x96xf32>
    %4 = vector.extract_strided_slice %3 {offsets = [0, 0], sizes = [1, 96], strides = [1, 1]} : vector<4x96xf32> to vector<1x96xf32>
    %5 = vector.extract_strided_slice %3 {offsets = [1, 0], sizes = [1, 64], strides = [1, 1]} : vector<4x96xf32> to vector<1x64xf32>
    %6 = vector.extract_strided_slice %3 {offsets = [2, 0], sizes = [1, 32], strides = [1, 1]} : vector<4x96xf32> to vector<1x32xf32>
    %7 = vector.extract_strided_slice %3 {offsets = [3, 0], sizes = [1, 32], strides = [1, 1]} : vector<4x96xf32> to vector<1x32xf32>
    %c0_6 = arith.constant 0 : index
    %c0_7 = arith.constant 0 : index
    %8 = vector.load %arg4[%c0_6, %c0_7] : memref<32x192xbf16, #tpu.memory_space<vmem>>, vector<32x192xbf16>
    %9 = vector.extract_strided_slice %8 {offsets = [0, 0], sizes = [32, 96], strides = [1, 1]} : vector<32x192xbf16> to vector<32x96xbf16>
    %10 = vector.extract_strided_slice %8 {offsets = [0, 96], sizes = [32, 32], strides = [1, 1]} : vector<32x192xbf16> to vector<32x32xbf16>
    %11 = vector.extract_strided_slice %8 {offsets = [0, 128], sizes = [32, 64], strides = [1, 1]} : vector<32x192xbf16> to vector<32x64xbf16>
    %c0_8 = arith.constant 0 : index
    %c0_9 = arith.constant 0 : index
    %12 = vector.load %arg5[%c0_8, %c0_9] : memref<64x32xbf16, #tpu.memory_space<vmem>>, vector<64x32xbf16>
    %cst = arith.constant dense<0.000000e+00> : vector<64xf32>
    %13 = vector.multi_reduction <add>, %1, %cst [1] : vector<64x32xf32> to vector<64xf32>
    %14 = vector.shape_cast %13 : vector<64xf32> to vector<64x1xf32>
    %cst_10 = arith.constant 3.200000e+01 : f32
    %15 = vector.broadcast %cst_10 : f32 to vector<64x1xf32>
    %16 = arith.divf %14, %15 : vector<64x1xf32>
    %17 = vector.broadcast %16 : vector<64x1xf32> to vector<64x32xf32>
    %18 = arith.subf %1, %17 : vector<64x32xf32>
    %19 = arith.mulf %18, %18 : vector<64x32xf32>
    %cst_11 = arith.constant dense<0.000000e+00> : vector<64xf32>
    %20 = vector.multi_reduction <add>, %19, %cst_11 [1] : vector<64x32xf32> to vector<64xf32>
    %21 = vector.shape_cast %20 : vector<64xf32> to vector<64x1xf32>
    %cst_12 = arith.constant 3.200000e+01 : f32
    %22 = vector.broadcast %cst_12 : f32 to vector<64x1xf32>
    %23 = arith.divf %21, %22 : vector<64x1xf32>
    %24 = vector.broadcast %16 : vector<64x1xf32> to vector<64x32xf32>
    %25 = arith.subf %1, %24 : vector<64x32xf32>
    %cst_13 = arith.constant 9.99999996E-13 : f32
    %26 = vector.broadcast %cst_13 : f32 to vector<64x1xf32>
    %27 = arith.addf %23, %26 : vector<64x1xf32>
    %28 = math.rsqrt %27 : vector<64x1xf32>
    %29 = vector.broadcast %28 : vector<64x1xf32> to vector<64x32xf32>
    %30 = arith.mulf %25, %29 : vector<64x32xf32>
    %31 = arith.truncf %30 : vector<64x32xf32> to vector<64x32xbf16>
    %cst_14 = arith.constant dense<0.000000e+00> : vector<64x96xf32>
    %32 = tpu.matmul %31, %9, %cst_14 {dimension_numbers = #tpu.dot_dimension_numbers<[1], [0], [0], [1], [0, 0, 1, 1], [], []>} : vector<64x32xbf16>, vector<32x96xbf16>, vector<64x96xf32> -> vector<64x96xf32>
    %33 = vector.broadcast %4 : vector<1x96xf32> to vector<64x96xf32>
    %34 = arith.addf %32, %33 : vector<64x96xf32>
    %35 = arith.truncf %34 : vector<64x96xf32> to vector<64x96xbf16>
    %36 = vector.extract_strided_slice %35 {offsets = [0, 0], sizes = [32, 16], strides = [1, 1]} : vector<64x96xbf16> to vector<32x16xbf16>
    %37 = vector.extract_strided_slice %35 {offsets = [0, 32], sizes = [32, 16], strides = [1, 1]} : vector<64x96xbf16> to vector<32x16xbf16>
    %38 = vector.extract_strided_slice %35 {offsets = [0, 64], sizes = [32, 16], strides = [1, 1]} : vector<64x96xbf16> to vector<32x16xbf16>
    %cst_15 = arith.constant dense<0.000000e+00> : vector<32x32xf32>
    %39 = tpu.matmul %36, %37, %cst_15 {dimension_numbers = #tpu.dot_dimension_numbers<[1], [1], [0], [0], [0, 0, 1, 0], [], []>} : vector<32x16xbf16>, vector<32x16xbf16>, vector<32x32xf32> -> vector<32x32xf32>
    %40 = arith.addf %39, %2 : vector<32x32xf32>
    %cst_16 = arith.constant dense<0xFF800000> : vector<32xf32>
    %41 = vector.multi_reduction <maximumf>, %40, %cst_16 [1] : vector<32x32xf32> to vector<32xf32>
    %42 = vector.shape_cast %41 : vector<32xf32> to vector<32x1xf32>
    %43 = vector.broadcast %42 : vector<32x1xf32> to vector<32x32xf32>
    %44 = arith.subf %40, %43 : vector<32x32xf32>
    %45 = math.exp %44 : vector<32x32xf32>
    %cst_17 = arith.constant dense<0.000000e+00> : vector<32xf32>
    %46 = vector.multi_reduction <add>, %45, %cst_17 [1] : vector<32x32xf32> to vector<32xf32>
    %47 = vector.shape_cast %46 : vector<32xf32> to vector<32x1xf32>
    %48 = tpu.reciprocal %47 {approx = true} : vector<32x1xf32> -> vector<32x1xf32>
    %49 = vector.broadcast %48 : vector<32x1xf32> to vector<32x32xf32>
    %50 = arith.mulf %45, %49 : vector<32x32xf32>
    %51 = arith.truncf %50 : vector<32x32xf32> to vector<32x32xbf16>
    %cst_18 = arith.constant dense<0.000000e+00> : vector<32x16xf32>
    %52 = tpu.matmul %51, %38, %cst_18 {dimension_numbers = #tpu.dot_dimension_numbers<[1], [0], [0], [1], [0, 0, 1, 1], [], []>} : vector<32x32xbf16>, vector<32x16xbf16>, vector<32x16xf32> -> vector<32x16xf32>
    %53 = vector.extract_strided_slice %35 {offsets = [0, 16], sizes = [32, 16], strides = [1, 1]} : vector<64x96xbf16> to vector<32x16xbf16>
    %54 = vector.extract_strided_slice %35 {offsets = [0, 48], sizes = [32, 16], strides = [1, 1]} : vector<64x96xbf16> to vector<32x16xbf16>
    %55 = vector.extract_strided_slice %35 {offsets = [0, 80], sizes = [32, 16], strides = [1, 1]} : vector<64x96xbf16> to vector<32x16xbf16>
    %cst_19 = arith.constant dense<0.000000e+00> : vector<32x32xf32>
    %56 = tpu.matmul %53, %54, %cst_19 {dimension_numbers = #tpu.dot_dimension_numbers<[1], [1], [0], [0], [0, 0, 1, 0], [], []>} : vector<32x16xbf16>, vector<32x16xbf16>, vector<32x32xf32> -> vector<32x32xf32>
    %57 = arith.addf %56, %2 : vector<32x32xf32>
    %cst_20 = arith.constant dense<0xFF800000> : vector<32xf32>
    %58 = vector.multi_reduction <maximumf>, %57, %cst_20 [1] : vector<32x32xf32> to vector<32xf32>
    %59 = vector.shape_cast %58 : vector<32xf32> to vector<32x1xf32>
    %60 = vector.broadcast %59 : vector<32x1xf32> to vector<32x32xf32>
    %61 = arith.subf %57, %60 : vector<32x32xf32>
    %62 = math.exp %61 : vector<32x32xf32>
    %cst_21 = arith.constant dense<0.000000e+00> : vector<32xf32>
    %63 = vector.multi_reduction <add>, %62, %cst_21 [1] : vector<32x32xf32> to vector<32xf32>
    %64 = vector.shape_cast %63 : vector<32xf32> to vector<32x1xf32>
    %65 = tpu.reciprocal %64 {approx = true} : vector<32x1xf32> -> vector<32x1xf32>
    %66 = vector.broadcast %65 : vector<32x1xf32> to vector<32x32xf32>
    %67 = arith.mulf %62, %66 : vector<32x32xf32>
    %68 = arith.truncf %67 : vector<32x32xf32> to vector<32x32xbf16>
    %cst_22 = arith.constant dense<0.000000e+00> : vector<32x16xf32>
    %69 = tpu.matmul %68, %55, %cst_22 {dimension_numbers = #tpu.dot_dimension_numbers<[1], [0], [0], [1], [0, 0, 1, 1], [], []>} : vector<32x32xbf16>, vector<32x16xbf16>, vector<32x16xf32> -> vector<32x16xf32>
    %70 = tpu.concatenate %52, %69 in 1 : vector<32x16xf32>, vector<32x16xf32> -> vector<32x32xf32>
    %71 = vector.extract_strided_slice %35 {offsets = [32, 0], sizes = [32, 16], strides = [1, 1]} : vector<64x96xbf16> to vector<32x16xbf16>
    %72 = vector.extract_strided_slice %35 {offsets = [32, 32], sizes = [32, 16], strides = [1, 1]} : vector<64x96xbf16> to vector<32x16xbf16>
    %73 = vector.extract_strided_slice %35 {offsets = [32, 64], sizes = [32, 16], strides = [1, 1]} : vector<64x96xbf16> to vector<32x16xbf16>
    %cst_23 = arith.constant dense<0.000000e+00> : vector<32x32xf32>
    %74 = tpu.matmul %71, %72, %cst_23 {dimension_numbers = #tpu.dot_dimension_numbers<[1], [1], [0], [0], [0, 0, 1, 0], [], []>} : vector<32x16xbf16>, vector<32x16xbf16>, vector<32x32xf32> -> vector<32x32xf32>
    %75 = arith.addf %74, %2 : vector<32x32xf32>
    %cst_24 = arith.constant dense<0xFF800000> : vector<32xf32>
    %76 = vector.multi_reduction <maximumf>, %75, %cst_24 [1] : vector<32x32xf32> to vector<32xf32>
    %77 = vector.shape_cast %76 : vector<32xf32> to vector<32x1xf32>
    %78 = vector.broadcast %77 : vector<32x1xf32> to vector<32x32xf32>
    %79 = arith.subf %75, %78 : vector<32x32xf32>
    %80 = math.exp %79 : vector<32x32xf32>
    %cst_25 = arith.constant dense<0.000000e+00> : vector<32xf32>
    %81 = vector.multi_reduction <add>, %80, %cst_25 [1] : vector<32x32xf32> to vector<32xf32>
    %82 = vector.shape_cast %81 : vector<32xf32> to vector<32x1xf32>
    %83 = tpu.reciprocal %82 {approx = true} : vector<32x1xf32> -> vector<32x1xf32>
    %84 = vector.broadcast %83 : vector<32x1xf32> to vector<32x32xf32>
    %85 = arith.mulf %80, %84 : vector<32x32xf32>
    %86 = arith.truncf %85 : vector<32x32xf32> to vector<32x32xbf16>
    %cst_26 = arith.constant dense<0.000000e+00> : vector<32x16xf32>
    %87 = tpu.matmul %86, %73, %cst_26 {dimension_numbers = #tpu.dot_dimension_numbers<[1], [0], [0], [1], [0, 0, 1, 1], [], []>} : vector<32x32xbf16>, vector<32x16xbf16>, vector<32x16xf32> -> vector<32x16xf32>
    %88 = vector.extract_strided_slice %35 {offsets = [32, 16], sizes = [32, 16], strides = [1, 1]} : vector<64x96xbf16> to vector<32x16xbf16>
    %89 = vector.extract_strided_slice %35 {offsets = [32, 48], sizes = [32, 16], strides = [1, 1]} : vector<64x96xbf16> to vector<32x16xbf16>
    %90 = vector.extract_strided_slice %35 {offsets = [32, 80], sizes = [32, 16], strides = [1, 1]} : vector<64x96xbf16> to vector<32x16xbf16>
    %cst_27 = arith.constant dense<0.000000e+00> : vector<32x32xf32>
    %91 = tpu.matmul %88, %89, %cst_27 {dimension_numbers = #tpu.dot_dimension_numbers<[1], [1], [0], [0], [0, 0, 1, 0], [], []>} : vector<32x16xbf16>, vector<32x16xbf16>, vector<32x32xf32> -> vector<32x32xf32>
    %92 = arith.addf %91, %2 : vector<32x32xf32>
    %cst_28 = arith.constant dense<0xFF800000> : vector<32xf32>
    %93 = vector.multi_reduction <maximumf>, %92, %cst_28 [1] : vector<32x32xf32> to vector<32xf32>
    %94 = vector.shape_cast %93 : vector<32xf32> to vector<32x1xf32>
    %95 = vector.broadcast %94 : vector<32x1xf32> to vector<32x32xf32>
    %96 = arith.subf %92, %95 : vector<32x32xf32>
    %97 = math.exp %96 : vector<32x32xf32>
    %cst_29 = arith.constant dense<0.000000e+00> : vector<32xf32>
    %98 = vector.multi_reduction <add>, %97, %cst_29 [1] : vector<32x32xf32> to vector<32xf32>
    %99 = vector.shape_cast %98 : vector<32xf32> to vector<32x1xf32>
    %100 = tpu.reciprocal %99 {approx = true} : vector<32x1xf32> -> vector<32x1xf32>
    %101 = vector.broadcast %100 : vector<32x1xf32> to vector<32x32xf32>
    %102 = arith.mulf %97, %101 : vector<32x32xf32>
    %103 = arith.truncf %102 : vector<32x32xf32> to vector<32x32xbf16>
    %cst_30 = arith.constant dense<0.000000e+00> : vector<32x16xf32>
    %104 = tpu.matmul %103, %90, %cst_30 {dimension_numbers = #tpu.dot_dimension_numbers<[1], [0], [0], [1], [0, 0, 1, 1], [], []>} : vector<32x32xbf16>, vector<32x16xbf16>, vector<32x16xf32> -> vector<32x16xf32>
    %105 = tpu.concatenate %87, %104 in 1 : vector<32x16xf32>, vector<32x16xf32> -> vector<32x32xf32>
    %106 = tpu.concatenate %70, %105 in 0 : vector<32x32xf32>, vector<32x32xf32> -> vector<64x32xf32>
    %107 = arith.truncf %106 : vector<64x32xf32> to vector<64x32xbf16>
    %cst_31 = arith.constant dense<0.000000e+00> : vector<64x32xf32>
    %108 = tpu.matmul %107, %10, %cst_31 {dimension_numbers = #tpu.dot_dimension_numbers<[1], [0], [0], [1], [0, 0, 1, 1], [], []>} : vector<64x32xbf16>, vector<32x32xbf16>, vector<64x32xf32> -> vector<64x32xf32>
    %109 = vector.broadcast %6 : vector<1x32xf32> to vector<64x32xf32>
    %110 = arith.addf %108, %109 : vector<64x32xf32>
    %111 = arith.addf %1, %110 : vector<64x32xf32>
    %cst_32 = arith.constant dense<0.000000e+00> : vector<64xf32>
    %112 = vector.multi_reduction <add>, %111, %cst_32 [1] : vector<64x32xf32> to vector<64xf32>
    %113 = vector.shape_cast %112 : vector<64xf32> to vector<64x1xf32>
    %cst_33 = arith.constant 3.200000e+01 : f32
    %114 = vector.broadcast %cst_33 : f32 to vector<64x1xf32>
    %115 = arith.divf %113, %114 : vector<64x1xf32>
    %116 = vector.broadcast %115 : vector<64x1xf32> to vector<64x32xf32>
    %117 = arith.subf %111, %116 : vector<64x32xf32>
    %118 = arith.mulf %117, %117 : vector<64x32xf32>
    %cst_34 = arith.constant dense<0.000000e+00> : vector<64xf32>
    %119 = vector.multi_reduction <add>, %118, %cst_34 [1] : vector<64x32xf32> to vector<64xf32>
    %120 = vector.shape_cast %119 : vector<64xf32> to vector<64x1xf32>
    %cst_35 = arith.constant 3.200000e+01 : f32
    %121 = vector.broadcast %cst_35 : f32 to vector<64x1xf32>
    %122 = arith.divf %120, %121 : vector<64x1xf32>
    %123 = vector.broadcast %115 : vector<64x1xf32> to vector<64x32xf32>
    %124 = arith.subf %111, %123 : vector<64x32xf32>
    %cst_36 = arith.constant 9.99999996E-13 : f32
    %125 = vector.broadcast %cst_36 : f32 to vector<64x1xf32>
    %126 = arith.addf %122, %125 : vector<64x1xf32>
    %127 = math.rsqrt %126 : vector<64x1xf32>
    %128 = vector.broadcast %127 : vector<64x1xf32> to vector<64x32xf32>
    %129 = arith.mulf %124, %128 : vector<64x32xf32>
    %130 = arith.truncf %129 : vector<64x32xf32> to vector<64x32xbf16>
    %cst_37 = arith.constant dense<0.000000e+00> : vector<64x64xf32>
    %131 = tpu.matmul %130, %11, %cst_37 {dimension_numbers = #tpu.dot_dimension_numbers<[1], [0], [0], [1], [0, 0, 1, 1], [], []>} : vector<64x32xbf16>, vector<32x64xbf16>, vector<64x64xf32> -> vector<64x64xf32>
    %132 = vector.broadcast %5 : vector<1x64xf32> to vector<64x64xf32>
    %133 = arith.addf %131, %132 : vector<64x64xf32>
    %134 = arith.mulf %133, %133 : vector<64x64xf32>
    %135 = arith.mulf %133, %134 : vector<64x64xf32>
    %cst_38 = arith.constant 4.471500e-02 : f32
    %136 = vector.broadcast %cst_38 : f32 to vector<64x64xf32>
    %137 = arith.mulf %136, %135 : vector<64x64xf32>
    %138 = arith.addf %133, %137 : vector<64x64xf32>
    %cst_39 = arith.constant 0.797884583 : f32
    %139 = vector.broadcast %cst_39 : f32 to vector<64x64xf32>
    %140 = arith.mulf %139, %138 : vector<64x64xf32>
    %141 = math.tanh %140 : vector<64x64xf32>
    %cst_40 = arith.constant 1.000000e+00 : f32
    %142 = vector.broadcast %cst_40 : f32 to vector<64x64xf32>
    %143 = arith.addf %142, %141 : vector<64x64xf32>
    %cst_41 = arith.constant 5.000000e-01 : f32
    %144 = vector.broadcast %cst_41 : f32 to vector<64x64xf32>
    %145 = arith.mulf %144, %143 : vector<64x64xf32>
    %146 = arith.mulf %133, %145 : vector<64x64xf32>
    %147 = arith.truncf %146 : vector<64x64xf32> to vector<64x64xbf16>
    %cst_42 = arith.constant dense<0.000000e+00> : vector<64x32xf32>
    %148 = tpu.matmul %147, %12, %cst_42 {dimension_numbers = #tpu.dot_dimension_numbers<[1], [0], [0], [1], [0, 0, 1, 1], [], []>} : vector<64x64xbf16>, vector<64x32xbf16>, vector<64x32xf32> -> vector<64x32xf32>
    %149 = vector.broadcast %7 : vector<1x32xf32> to vector<64x32xf32>
    %150 = arith.addf %148, %149 : vector<64x32xf32>
    %151 = arith.addf %111, %150 : vector<64x32xf32>
    %152 = vector.shape_cast %151 : vector<64x32xf32> to vector<2x32x32xf32>
    %c0_43 = arith.constant 0 : index
    %c0_44 = arith.constant 0 : index
    %c0_45 = arith.constant 0 : index
    %153 = vector.load %arg6[%c0_43, %c0_44, %c0_45] : memref<2x32x32xf32, #tpu.memory_space<vmem>>, vector<2x32x32xf32>
    tpu.vector_store %arg6[%c0_43, %c0_44, %c0_45], %152 {strides = array<i32>} : memref<2x32x32xf32, #tpu.memory_space<vmem>>, vector<2x32x32xf32>,
    return
  }
  func.func @transform_0(%arg0: i32) -> (i32, i32, i32) {
    %c0_i32 = arith.constant 0 : i32
    %c0_i32_0 = arith.constant 0 : i32
    %c0_i32_1 = arith.constant 0 : i32
    %c0_i32_2 = arith.constant 0 : i32
    return %c0_i32, %c0_i32_0, %c0_i32_1 : i32, i32, i32
  }
  func.func @transform_1(%arg0: i32) -> (i32, i32) {
    %c0_i32 = arith.constant 0 : i32
    %c0_i32_0 = arith.constant 0 : i32
    %c0_i32_1 = arith.constant 0 : i32
    return %c0_i32, %c0_i32_0 : i32, i32
  }
  func.func @transform_2(%arg0: i32) -> (i32, i32) {
    %c0_i32 = arith.constant 0 : i32
    %c0_i32_0 = arith.constant 0 : i32
    %c0_i32_1 = arith.constant 0 : i32
    return %c0_i32, %c0_i32_0 : i32, i32
  }
  func.func @transform_3(%arg0: i32) -> (i32, i32) {
    %c0_i32 = arith.constant 0 : i32
    %c0_i32_0 = arith.constant 0 : i32
    %c0_i32_1 = arith.constant 0 : i32
    return %c0_i32, %c0_i32_0 : i32, i32
  }
  func.func @transform_4(%arg0: i32) -> (i32, i32) {
    %c0_i32 = arith.constant 0 : i32
    %c0_i32_0 = arith.constant 0 : i32
    %c0_i32_1 = arith.constant 0 : i32
    return %c0_i32, %c0_i32_0 : i32, i32
  }
  func.func @transform_5(%arg0: i32) -> (i32, i32, i32) {
    %c0_i32 = arith.constant 0 : i32
    %c0_i32_0 = arith.constant 0 : i32
    %c0_i32_1 = arith.constant 0 : i32
    %c0_i32_2 = arith.constant 0 : i32
    return %c0_i32, %c0_i32_0, %c0_i32_1 : i32, i32, i32
  }
}

</mosaic_0001>

<bundles_post_ra>
// kernel: transformer_block.1
= control target key start
LH: loop header
LB: loop body
LE: loop exit
PB: predicated region body
PF: predicated region fallthrough
CT: control target
= control target key end

     0   :  { %10 = vsyncpa [#allocation3], 0  ;;  %s2513_s0 = inlined_call_operand.hbm [shape: f32[2,32,32], index: 0, kind: input, shape index: {}]   ;;  %s2514_s1 = inlined_call_operand.vmem [shape: f32[32,32], index: 1, kind: input, shape index: {}]   ;;  %s2515_s2 = inlined_call_operand.vmem [shape: f32[4,96], index: 2, kind: input, shape index: {}]   ;;  %s2516_s3 = inlined_call_operand.hbm [shape: bf16[32,192], index: 3, kind: input, shape index: {}]   ;;  %s2517_s4 = inlined_call_operand.vmem [shape: bf16[64,32], index: 4, kind: input, shape index: {}]   ;;  %s2518_s5 = inlined_call_operand.hbm [shape: f32[2,32,32], index: 5, kind: output, shape index: {}]  }
   0x1   :  { %11 = vsyncpa [#allocation6], 0 }
   0x2   :  { %12 = vsyncpa [#allocation4], 0  ;;  %s1992_s18 = smov [#allocation2]   ;;  %s1920_s22 = scalar_lea.hbm %s2513_s0, 1024 }
   0x3   :  { %s18_s19 = sshll.u32 %s1992_s18, 4  ;;  %p1921_p0 = scmp.ne.s32.totalorder %s2513_s0, %s1920_s22  ;;  %s19_s19 = int_to_ptr.vmem [resolvable:$true] %s18_s19 }
   0x4   :  { %p1924_p1 = scmp.lt.u32.totalorder %s1920_s22, %s2513_s0 }
   0x6   :  { %p1926_p2 = pnand %p1924_p1, %p1921_p0 }
   0x8   :  { %1929 = shalt.err (!%p1926_p2)
}
   0x9   :  { %s1930_s27 = scalar_lea.vmem %s19_s19, 1024  ;;  %p1935_p4 = scmp.lt.s32.totalorder %s19_s19, %s19_s19 }
   0xa   :  { %p1931_p3 = scmp.ne.s32.totalorder %s19_s19, %s1930_s27  ;;  %p1936_p5 = scmp.lt.s32.totalorder %s1930_s27, %s1930_s27 }
   0xc   :  { %p1937_p6 = por %p1936_p5, %p1935_p4 }
   0xe   :  { %p1938_p7 = pnand %p1937_p6, %p1931_p3 }
  0x10   :  { %1941 = shalt.err (!%p1938_p7)
}
  0x11   :  { %s1993_s28 = smov 128   ;;  %s1994_s29 = smov 8  }
  0x12   :  { %24 = dma.hbm_to_vmem [thread:$0]  %s2513_s0, 1024, %s19_s19, [#allocation3], %s1993_s28, %s1993_s28, %s1994_s29  }
  0x13   :  { %s1995_s7 = smov [#allocation5]   ;;  %s1942_s11 = scalar_lea.hbm %s2516_s3, 512 }
  0x14   :  { %s34_s8 = sshll.u32 %s1995_s7, 4  ;;  %p1943_p8 = scmp.ne.s32.totalorder %s2516_s3, %s1942_s11  ;;  %s35_s8 = int_to_ptr.vmem [resolvable:$true] %s34_s8 }
  0x15   :  { %p1946_p9 = scmp.lt.u32.totalorder %s1942_s11, %s2516_s3 }
  0x17   :  { %p1948_p10 = pnand %p1946_p9, %p1943_p8 }
  0x19   :  { %1951 = shalt.err (!%p1948_p10)
}
  0x1a   :  { %s1952_s16 = scalar_lea.vmem %s35_s8, 512  ;;  %p1957_p12 = scmp.lt.s32.totalorder %s35_s8, %s35_s8 }
  0x1b   :  { %p1953_p11 = scmp.ne.s32.totalorder %s35_s8, %s1952_s16  ;;  %p1958_p13 = scmp.lt.s32.totalorder %s1952_s16, %s1952_s16 }
  0x1d   :  { %p1959_p0 = por %p1958_p13, %p1957_p12 }
  0x1f   :  { %p1960_p1 = pnand %p1959_p0, %p1953_p11 }
  0x21   :  { %1963 = shalt.err (!%p1960_p1)
}
  0x22   :  { %40 = dma.hbm_to_vmem [thread:$0]  %s2516_s3, 512, %s35_s8, [#allocation6], %s1993_s28, %s1993_s28, %s1994_s29  }
  0x23   :  { %1986 = dma.done.wait [#allocation3], 1024  }
  0x24   :  { %1987 = vsyncadd [#allocation3], 4294966272 }
  0x25   :  { %1988 = dma.done.wait [#allocation6], 512  }
  0x26   :  { %1989 = vsyncadd [#allocation6], 4294966784  ;;  %vm75_vm0 = vcmask 261120   ;;  %v50_v0 = vld [vmem:[#allocation2] sm:$0xff]  ;;  %v52_v1 = vld [vmem:[#allocation2 + $0x10] sm:$0xff]  ;;  %vm288_vm1 = vcmask 130048  }
  0x27   :  { %v51_v2 = vld [vmem:[#allocation2 + $0x8] sm:$0xff]  ;;  %v76_v3 = vsel %vm75_vm0, %v50_v0, 0.0  ;;  %v82_v4 = vsel %vm75_vm0, %v52_v1, 0.0  ;;  %v53_v5 = vld [vmem:[#allocation2 + $0x18] sm:$0xff]  ;;  %v54_v26 = vld [vmem:[#allocation2 + $0x20] sm:$0xff]  ;;  %s1996_s19 = smov 96  }
  0x28   :  { %77 = vadd.xlane.f32.xlu0 %v76_v3  ;;  %83 = vadd.xlane.f32.xlu1 %v82_v4  ;;  %v79_v6 = vsel %vm75_vm0, %v51_v2, 0.0  ;;  %v85_v7 = vsel %vm75_vm0, %v53_v5, 0.0  ;;  %v88_v29 = vsel %vm75_vm0, %v54_v26, 0.0  ;;  %v55_v30 = vld [vmem:[#allocation2 + $0x28] sm:$0xff]  ;;  %v56_v31 = vld [vmem:[#allocation2 + $0x30] sm:$0xff]  ;;  %v57_v34 = vld [vmem:[#allocation2 + $0x38] sm:$0xff] }
  0x29   :  { %v91_v32 = vsel %vm75_vm0, %v55_v30, 0.0  ;;  %v94_v33 = vsel %vm75_vm0, %v56_v31, 0.0  ;;  %v97_v35 = vsel %vm75_vm0, %v57_v34, 0.0  ;;  %v2092_v36 = vld [vmem:[#allocation5] ss:$8 sps:$4 sm:$0xff]   ;;  %s1997_s20 = smov 80  }
  0x2a   :  { %v2094_v37 = vld [vmem:[#allocation5 + $0x10] ss:$8 sps:$4 sm:$0xff]   ;;  %1633 = vmatprep.subr.bf16.mxu1 %v2092_v36  ;;  %s1998_s21 = smov 112   ;;  %s2000_s7 = smov 48   ;;  %vm1423_vm2 = vcmask 523264  }
  0x2b   :  { %1634 = vmatpush3.bf16.msra.mxu1 %v2092_v36  ;;  %s2001_s8 = smov 32   ;;  %s2002_s9 = smov 16  }
  0x2c   :  { %80 = vadd.xlane.f32.xlu0 %v79_v6  ;;  %86 = vadd.xlane.f32.xlu1 %v85_v7 }
  0x2d   :  { %1635 = vmatprep.subr.bf16.mxu1 %v2094_v37 }
  0x2f   :  { %1636 = vmatpush3.bf16.msra.mxu1 %v2094_v37 }
  0xb5   :  { %v78_v8 = vpop.xlane.xlu0 %77  ;;  %v84_v9 = vpop.xlane.xlu1 %83 }
  0xb6   :  { %v101_v10 = vmul.f32 0.03125, %v78_v8  ;;  %v103_v11 = vmul.f32 0.03125, %v84_v9 }
  0xb8   :  { %v2068_v12 = vsub.f32 %v50_v0, %v101_v10  ;;  %v2070_v13 = vsub.f32 %v52_v1, %v103_v11 }
  0xb9   :  { %v81_v14 = vpop.xlane.xlu0 %80  ;;  %v87_v15 = vpop.xlane.xlu1 %86 }
  0xba   :  { %v102_v16 = vmul.f32 0.03125, %v81_v14  ;;  %v104_v17 = vmul.f32 0.03125, %v87_v15  ;;  %v117_v18 = vmul.f32 %v2068_v12, %v2068_v12  ;;  %v119_v19 = vmul.f32 %v2070_v13, %v2070_v13 }
  0xbc   :  { %v2076_v20 = vsub.f32 %v51_v2, %v102_v16  ;;  %v2078_v21 = vsub.f32 %v53_v5, %v104_v17  ;;  %v125_v22 = vsel %vm75_vm0, %v117_v18, 0.0  ;;  %v131_v23 = vsel %vm75_vm0, %v119_v19, 0.0 }
  0xbd   :  { %126 = vadd.xlane.f32.xlu0 %v125_v22 }
  0xbe   :  { %v118_v24 = vmul.f32 %v2076_v20, %v2076_v20  ;;  %v120_v25 = vmul.f32 %v2078_v21, %v2078_v21 }
  0xc0   :  { %v128_v27 = vsel %vm75_vm0, %v118_v24, 0.0  ;;  %v134_v28 = vsel %vm75_vm0, %v120_v25, 0.0 }
  0xc1   :  { %132 = vadd.xlane.f32.xlu0 %v131_v23  ;;  %129 = vadd.xlane.f32.xlu1 %v128_v27 }
  0xc5   :  { %135 = vadd.xlane.f32.xlu1 %v134_v28  ;;  %89 = vadd.xlane.f32.xlu0 %v88_v29 }
  0xc9   :  { %92 = vadd.xlane.f32.xlu1 %v91_v32  ;;  %95 = vadd.xlane.f32.xlu0 %v94_v33 }
  0xcd   :  { %98 = vadd.xlane.f32.xlu1 %v97_v35 }
 0x14a   :  { %v127_v38 = vpop.xlane.xlu0 %126 }
 0x14b   :  { %v149_v39 = vmul.f32 0.03125, %v127_v38 }
 0x14d   :  { %v157_v40 = vadd.f32 1e-12, %v149_v39 }
 0x14e   :  { %v130_v41 = vpop.xlane.xlu1 %129  ;;  %v133_v42 = vpop.xlane.xlu0 %132 }
 0x14f   :  { %v150_v43 = vmul.f32 0.03125, %v130_v41  ;;  %v151_v44 = vmul.f32 0.03125, %v133_v42  ;;  %1799 = vrsqrt.f32 %v157_v40  ;;  %v185_v40 = vlaneseq }
 0x151   :  { %v158_v45 = vadd.f32 1e-12, %v150_v43  ;;  %v159_v46 = vadd.f32 1e-12, %v151_v44  ;;  %v2112_v41 = vshrl.u32 %v185_v40, 7 }
 0x152   :  { %v136_v47 = vpop.xlane.xlu1 %135  ;;  %v90_v48 = vpop.xlane.xlu0 %89  ;;  %v2118_v43 = vld [vmem:[%s2515_s2] sm:$0xf] }
 0x153   :  { %1801 = vrsqrt.f32 %v158_v45  ;;  %v152_v49 = vmul.f32 0.03125, %v136_v47  ;;  %v105_v50 = vmul.f32 0.03125, %v90_v48  ;;  %v187_v42 = vsub.s32 0, %v2112_v41 }
 0x154   :  { %1803 = vrsqrt.f32 %v159_v46 }
 0x155   :  { %v160_v51 = vadd.f32 1e-12, %v152_v49  ;;  %v113_v52 = vsub.f32 %v54_v26, %v105_v50  ;;  %v188_v44 = vrot.slane %v2118_v43, %v187_v42 }
 0x156   :  { %v93_v53 = vpop.xlane.xlu1 %92  ;;  %v96_v54 = vpop.xlane.xlu0 %95 }
 0x157   :  { %1805 = vrsqrt.f32 %v160_v51  ;;  %v106_v55 = vmul.f32 0.03125, %v93_v53  ;;  %v107_v56 = vmul.f32 0.03125, %v96_v54  ;;  %v121_v57 = vmul.f32 %v113_v52, %v113_v52 }
 0x159   :  { %v114_v58 = vsub.f32 %v55_v30, %v106_v55  ;;  %v115_v59 = vsub.f32 %v56_v31, %v107_v56  ;;  %v137_v60 = vsel %vm75_vm0, %v121_v57, 0.0  ;;  %v1800_v62 = vpop.eup %1799 }
 0x15a   :  { %v99_v61 = vpop.xlane.xlu1 %98  ;;  %138 = vadd.xlane.f32.xlu0 %v137_v60  ;;  %v173_v6 = vmul.f32 %v1800_v62, %v2068_v12 }
 0x15b   :  { %v108_v63 = vmul.f32 0.03125, %v99_v61  ;;  %v122_v0 = vmul.f32 %v114_v58, %v114_v58  ;;  %v123_v1 = vmul.f32 %v115_v59, %v115_v59 }
 0x15d   :  { %v1802_v2 = vpop.eup %1801  ;;  %v116_v3 = vsub.f32 %v57_v34, %v108_v63  ;;  %v140_v4 = vsel %vm75_vm0, %v122_v0, 0.0  ;;  %v143_v5 = vsel %vm75_vm0, %v123_v1, 0.0 }
 0x15e   :  { %v174_v7 = vmul.f32 %v1802_v2, %v2076_v20  ;;  %141 = vadd.xlane.f32.xlu1 %v140_v4  ;;  %144 = vadd.xlane.f32.xlu0 %v143_v5  ;;  %v1804_v8 = vpop.eup %1803 }
 0x15f   :  { %v124_v9 = vmul.f32 %v116_v3, %v116_v3  ;;  %v175_v15 = vmul.f32 %v1804_v8, %v2070_v13 }
 0x160   :  { %v181_v10 = vpack.c.bf16 %v174_v7, %v173_v6 }
 0x161   :  { %v1806_v11 = vpop.eup %1805  ;;  %v146_v14 = vsel %vm75_vm0, %v124_v9, 0.0 }
 0x162   :  { %1637 = vmatprep.mubr.msk.bf16.mxu1 %vm75_vm0, %v181_v10  ;;  %v176_v16 = vmul.f32 %v1806_v11, %v2078_v21  ;;  %147 = vadd.xlane.f32.xlu1 %v146_v14  ;;  %v2158_v11 = vld [vmem:[%s2514_s1] sm:$0xff] }
 0x164   :  { %v182_v17 = vpack.c.bf16 %v176_v16, %v175_v15  ;;  %v2163_v15 = vld [vmem:[%s2514_s1 + $0x10] sm:$0xff] }
 0x166   :  { %1638 = vmatmul.mubr.msk.bf16.vlgmr.msra.gmra.mrb[0].mxu1 %vm75_vm0, %v182_v17  ;;  %v2168_v17 = vld [vmem:[%s2514_s1 + $0x8] sm:$0xff] }
 0x1e7   :  { %v139_v12 = vpop.xlane.xlu0 %138 }
 0x1e8   :  { %v153_v18 = vmul.f32 0.03125, %v139_v12 }
 0x1ea   :  { %v161_v19 = vadd.f32 1e-12, %v153_v18 }
 0x1eb   :  { %v142_v20 = vpop.xlane.xlu1 %141  ;;  %v145_v22 = vpop.xlane.xlu0 %144 }
 0x1ec   :  { %v154_v23 = vmul.f32 0.03125, %v142_v20  ;;  %1807 = vrsqrt.f32 %v161_v19  ;;  %v155_v24 = vmul.f32 0.03125, %v145_v22 }
 0x1ee   :  { %v162_v25 = vadd.f32 1e-12, %v154_v23  ;;  %v163_v26 = vadd.f32 1e-12, %v155_v24  ;;  %v2177_v24 = vld [vmem:[%s2514_s1 + $0x18] sm:$0xff]  ;;  %s1999_s1 = smov 64  }
 0x1ef   :  { %v148_v27 = vpop.xlane.xlu1 %147 }
 0x1f0   :  { %1809 = vrsqrt.f32 %v162_v25  ;;  %v156_v28 = vmul.f32 0.03125, %v148_v27 }
 0x1f1   :  { %1811 = vrsqrt.f32 %v163_v26 }
 0x1f2   :  { %v164_v13 = vadd.f32 1e-12, %v156_v28 }
 0x1f4   :  { %1813 = vrsqrt.f32 %v164_v13 }
 0x1f6   :  { %v1808_v21 = vpop.eup %1807 }
 0x1f7   :  { %v177_v29 = vmul.f32 %v1808_v21, %v113_v52 }
 0x1fa   :  { %v1810_v30 = vpop.eup %1809 }
 0x1fb   :  { %v1812_v31 = vpop.eup %1811  ;;  %v178_v32 = vmul.f32 %v1810_v30, %v114_v58 }
 0x1fc   :  { %v179_v34 = vmul.f32 %v1812_v31, %v115_v59 }
 0x1fd   :  { %v183_v33 = vpack.c.bf16 %v178_v32, %v177_v29 }
 0x1fe   :  { %v1814_v35 = vpop.eup %1813 }
 0x1ff   :  { %1641 = vmatprep.mubr.msk.bf16.mxu1 %vm75_vm0, %v183_v33  ;;  %v180_v38 = vmul.f32 %v1814_v35, %v116_v3 }
 0x201   :  { %v184_v39 = vpack.c.bf16 %v180_v38, %v179_v34 }
 0x203   :  { %1642 = vmatmul.mubr.msk.bf16.gmra.mrb[4].mxu1 %vm75_vm0, %v184_v39 }
 0x239   :  { %v1639_v45 = vpop.f32.mrb[0].mxu1 }
 0x23a   :  { %v247_v46 = vpop.f32.mrb[1].mxu1  ;;  %v256_v48 = vadd.f32 %v1639_v45, %v188_v44 }
 0x23b   :  { %v1640_v47 = vpop.f32.mrb[2].mxu1  ;;  %v248_v51 = vadd.f32 %v247_v46, %v188_v44 }
 0x23c   :  { %v259_v49 = vadd.f32 %v1640_v47, %v188_v44  ;;  %v250_v50 = vpop.f32.mrb[3].mxu1 }
 0x23d   :  { %v251_v52 = vadd.f32 %v250_v50, %v188_v44 }
 0x23e   :  { %v2121_v53 = vpack.c.bf16 %v259_v49, %v256_v48 }
 0x23f   :  { %v2123_v54 = vpack.c.bf16 %v251_v52, %v248_v51 }
 0x240   :  { %286 = vrot.lane.b32.xlu1 %v2121_v53, %s1996_s19 }
 0x241   :  { %284 = vrot.lane.b32.xlu0 %v2123_v54, %s1996_s19  ;;  %1649 = vmatprep.mubr.msk.bf16.mxu1 %vm288_vm1, %v2123_v54 }
 0x244   :  { %461 = vrot.lane.b32.xlu1 %v2123_v54, %s1997_s20 }
 0x245   :  { %457 = vrot.lane.b32.xlu0 %v2123_v54, %s1998_s21 }
 0x248   :  { %463 = vrot.lane.b32.xlu1 %v2121_v53, %s1997_s20 }
 0x24c   :  { %459 = vrot.lane.b32.xlu1 %v2121_v53, %s1998_s21 }
 0x2b2   :  { %v287_v57 = vpop.permute.xlu1 %286 }
 0x2b3   :  { %v285_v55 = vpop.permute.xlu0 %284  ;;  %v299_v58 = vsel %vm288_vm1, %v287_v57, 0 }
 0x2b4   :  { %v296_v56 = vsel %vm288_vm1, %v285_v55, 0  ;;  %1749 = vmatprep.subr.msk.bf16.mxu1 %vm288_vm1, %v285_v55 }
 0x2b5   :  { %1646 = vmatpush3.bf16.xpose.msra.mxu1 %v296_v56 }
 0x2b6   :  { %1750 = vmatprep.subr.msk.bf16.mxu1 %vm288_vm1, %v287_v57  ;;  %v462_v59 = vpop.permute.xlu1 %461 }
 0x2b7   :  { %v472_v60 = vsel %vm288_vm1, %v462_v59, 0  ;;  %v458_v61 = vpop.permute.xlu0 %457 }
 0x2ba   :  { %v464_v62 = vpop.permute.xlu1 %463 }
 0x2bb   :  { %v475_v63 = vsel %vm288_vm1, %v464_v62, 0 }
 0x2bd   :  { %1648 = vmatpush3.bf16.xpose.msra.mxu1 %v299_v58 }
 0x2be   :  { %1751 = vmatprep.subr.msk.bf16.mxu1 %vm288_vm1, %v462_v59  ;;  %v460_v0 = vpop.permute.xlu1 %459 }
 0x2c4   :  { %1650 = vmatmul.mubr.msk.bf16.vlgmr.msra.gmra.mrb[8].mxu1 %vm288_vm1, %v2121_v53 }
 0x2c5   :  { %1662 = vmatpush3.bf16.xpose.msra.mxu1 %v472_v60  ;;  %1665 = vmatprep.mubr.msk.bf16.mxu1 %vm288_vm1, %v458_v61 }
 0x2c6   :  { %1752 = vmatprep.subr.msk.bf16.mxu1 %vm288_vm1, %v464_v62 }
 0x2cd   :  { %1664 = vmatpush3.bf16.xpose.msra.mxu1 %v475_v63 }
 0x2d4   :  { %1666 = vmatmul.mubr.msk.bf16.vlgmr.msra.gmra.mrb[12].mxu1 %vm288_vm1, %v460_v0 }
 0x2d6   :  { %v1643_v1 = vpop.f32.mrb[4].mxu1 }
 0x2d7   :  { %v272_v2 = vadd.f32 %v1643_v1, %v188_v44  ;;  %v263_v3 = vpop.f32.mrb[5].mxu1 }
 0x2d8   :  { %v264_v4 = vadd.f32 %v263_v3, %v188_v44  ;;  %v1644_v5 = vpop.f32.mrb[6].mxu1 }
 0x2d9   :  { %v275_v6 = vadd.f32 %v1644_v5, %v188_v44  ;;  %v266_v7 = vpop.f32.mrb[7].mxu1 }
 0x2da   :  { %v267_v8 = vadd.f32 %v266_v7, %v188_v44 }
 0x2db   :  { %v2151_v9 = vpack.c.bf16 %v275_v6, %v272_v2 }
 0x2dc   :  { %v2153_v10 = vpack.c.bf16 %v267_v8, %v264_v4 }
 0x397   :  { %v1651_v14 = vpop.f32.mrb[8].mxu1 }
 0x398   :  { %v335_v16 = vpop.f32.mrb[9].mxu1  ;;  %v344_v20 = vadd.f32 %v1651_v14, %v2163_v15 }
 0x399   :  { %v336_v12 = vadd.f32 %v335_v16, %v2158_v11  ;;  %v1652_v18 = vpop.f32.mrb[10].mxu1 }
 0x39a   :  { %v338_v19 = vpop.f32.mrb[11].mxu1  ;;  %v347_v26 = vadd.f32 %v1652_v18, %v2177_v24  ;;  %v356_v27 = vsel %vm75_vm0, %v344_v20, -inf }
 0x39b   :  { %v339_v22 = vadd.f32 %v338_v19, %v2168_v17  ;;  %v350_v23 = vsel %vm75_vm0, %v336_v12, -inf }
 0x39c   :  { %351 = vmax.xlane.f32.xlu0 %v350_v23  ;;  %v359_v28 = vsel %vm75_vm0, %v347_v26, -inf }
 0x39d   :  { %v353_v25 = vsel %vm75_vm0, %v339_v22, -inf }
 0x39e   :  { %354 = vmax.xlane.f32.xlu1 %v353_v25 }
 0x3a0   :  { %357 = vmax.xlane.f32.xlu0 %v356_v27 }
 0x3a4   :  { %360 = vmax.xlane.f32.xlu0 %v359_v28 }
 0x3a7   :  { %v1667_v13 = vpop.f32.mrb[12].mxu1 }
 0x3a8   :  { %v511_v21 = vpop.f32.mrb[13].mxu1  ;;  %v520_v32 = vadd.f32 %v1667_v13, %v2163_v15 }
 0x3a9   :  { %v2184_v29 = vadd.f32 %v511_v21, %v2158_v11  ;;  %v1668_v30 = vpop.f32.mrb[14].mxu1 }
 0x3aa   :  { %v514_v31 = vpop.f32.mrb[15].mxu1  ;;  %v523_v35 = vadd.f32 %v1668_v30, %v2177_v24  ;;  %v532_v39 = vsel %vm75_vm0, %v520_v32, -inf }
 0x3ab   :  { %v515_v33 = vadd.f32 %v514_v31, %v2168_v17  ;;  %v526_v34 = vsel %vm75_vm0, %v2184_v29, -inf }
 0x3ac   :  { %527 = vmax.xlane.f32.xlu0 %v526_v34  ;;  %v535_v40 = vsel %vm75_vm0, %v523_v35, -inf }
 0x3ad   :  { %v529_v38 = vsel %vm75_vm0, %v515_v33, -inf }
 0x3ae   :  { %530 = vmax.xlane.f32.xlu1 %v529_v38 }
 0x3b0   :  { %533 = vmax.xlane.f32.xlu0 %v532_v39 }
 0x3b2   :  { %536 = vmax.xlane.f32.xlu1 %v535_v40 }
 0x3c3   :  { %398 = vrot.lane.b32.xlu1 %v2121_v53, %s1999_s1 }
 0x3c7   :  { %572 = vrot.lane.b32.xlu1 %v2123_v54, %s2000_s7 }
 0x429   :  { %v352_v42 = vpop.xlane.xlu0 %351 }
 0x42a   :  { %v362_v44 = vsub.f32 %v336_v12, %v352_v42 }
 0x42b   :  { %v355_v45 = vpop.xlane.xlu1 %354 }
 0x42c   :  { %v366_v48 = vmul.f32 1.442695, %v362_v44  ;;  %v363_v49 = vsub.f32 %v339_v22, %v355_v45 }
 0x42d   :  { %v358_v46 = vpop.xlane.xlu0 %357 }
 0x42e   :  { %v364_v47 = vsub.f32 %v344_v20, %v358_v46  ;;  %v368_v55 = vmul.f32 1.442695, %v363_v49 }
 0x430   :  { %v370_v50 = vmul.f32 1.442695, %v364_v47 }
 0x431   :  { %v361_v51 = vpop.xlane.xlu0 %360 }
 0x432   :  { %1815 = vpow2.f32 %v370_v50  ;;  %v365_v52 = vsub.f32 %v347_v26, %v361_v51 }
 0x433   :  { %1817 = vpow2.f32 %v366_v48 }
 0x434   :  { %v372_v56 = vmul.f32 1.442695, %v365_v52 }
 0x436   :  { %1819 = vpow2.f32 %v372_v56 }
 0x437   :  { %1821 = vpow2.f32 %v368_v55 }
 0x439   :  { %v528_v12 = vpop.xlane.xlu0 %527 }
 0x43a   :  { %v538_v20 = vsub.f32 %v2184_v29, %v528_v12 }
 0x43b   :  { %v531_v57 = vpop.xlane.xlu1 %530 }
 0x43c   :  { %v2198_v58 = vpop.eup %1815  ;;  %v539_v61 = vsub.f32 %v515_v33, %v531_v57  ;;  %v542_v23 = vmul.f32 1.442695, %v538_v20 }
 0x43d   :  { %v380_v59 = vsel %vm75_vm0, %v2198_v58, 0.0  ;;  %v2202_v60 = vpop.eup %1817  ;;  %v534_v18 = vpop.xlane.xlu0 %533 }
 0x43e   :  { %381 = vadd.xlane.f32.xlu0 %v380_v59  ;;  %v374_v1 = vsel %vm75_vm0, %v2202_v60, 0.0  ;;  %v544_v4 = vmul.f32 1.442695, %v539_v61  ;;  %v540_v19 = vsub.f32 %v520_v32, %v534_v18 }
 0x43f   :  { %v537_v62 = vpop.xlane.xlu1 %536 }
 0x440   :  { %v1820_v63 = vpop.eup %1819  ;;  %v541_v0 = vsub.f32 %v523_v35, %v537_v62  ;;  %v546_v22 = vmul.f32 1.442695, %v540_v19 }
 0x441   :  { %v383_v2 = vsel %vm75_vm0, %v1820_v63, 0.0  ;;  %v1822_v3 = vpop.eup %1821 }
 0x442   :  { %v548_v5 = vmul.f32 1.442695, %v541_v0  ;;  %375 = vadd.xlane.f32.xlu0 %v374_v1  ;;  %384 = vadd.xlane.f32.xlu1 %v383_v2  ;;  %v377_v6 = vsel %vm75_vm0, %v1822_v3, 0.0 }
 0x443   :  { %v399_v28 = vpop.permute.xlu1 %398 }
 0x444   :  { %1823 = vpow2.f32 %v548_v5 }
 0x445   :  { %1825 = vpow2.f32 %v544_v4 }
 0x446   :  { %378 = vadd.xlane.f32.xlu1 %v377_v6  ;;  %1827 = vpow2.f32 %v546_v22 }
 0x447   :  { %1829 = vpow2.f32 %v542_v23  ;;  %v573_v13 = vpop.permute.xlu1 %572 }
 0x44e   :  { %v2208_v7 = vpop.eup %1823 }
 0x44f   :  { %v559_v8 = vsel %vm75_vm0, %v2208_v7, 0.0  ;;  %v2212_v14 = vpop.eup %1825 }
 0x450   :  { %560 = vadd.xlane.f32.xlu1 %v559_v8  ;;  %v553_v16 = vsel %vm75_vm0, %v2212_v14, 0.0  ;;  %v1828_v25 = vpop.eup %1827 }
 0x451   :  { %v556_v26 = vsel %vm75_vm0, %v1828_v25, 0.0  ;;  %v1830_v27 = vpop.eup %1829 }
 0x454   :  { %554 = vadd.xlane.f32.xlu1 %v553_v16 }
 0x458   :  { %396 = vrot.lane.b32.xlu0 %v2123_v54, %s1999_s1  ;;  %v550_v54 = vsel %vm75_vm0, %v1830_v27, 0.0 }
 0x465   :  { %574 = vrot.lane.b32.xlu1 %v2121_v53, %s2000_s7 }
 0x469   :  { %657 = vrot.lane.b32.xlu1 %v2151_v9, %s1996_s19 }
 0x477   :  { %557 = vadd.xlane.f32.xlu0 %v556_v26 }
 0x47b   :  { %551 = vadd.xlane.f32.xlu0 %v550_v54 }
 0x491   :  { %655 = vrot.lane.b32.xlu0 %v2153_v10, %s1996_s19 }
 0x4cb   :  { %v382_v53 = vpop.xlane.xlu0 %381 }
 0x4cf   :  { %v385_v21 = vpop.xlane.xlu1 %384  ;;  %v376_v29 = vpop.xlane.xlu0 %375 }
 0x4d0   :  { %1831 = vrcp.f32 %v385_v21 }
 0x4d1   :  { %1833 = vrcp.f32 %v376_v29 }
 0x4d2   :  { %1835 = vrcp.f32 %v382_v53 }
 0x4d3   :  { %v379_v30 = vpop.xlane.xlu1 %378  ;;  %v397_v31 = vpop.permute.xlu0 %396 }
 0x4d4   :  { %1837 = vrcp.f32 %v379_v30  ;;  %1653 = vmatprep.subr.bf16.mxu0 %v397_v31 }
 0x4d5   :  { %1654 = vmatpush3.bf16.msra.mxu0 %v397_v31 }
 0x4d6   :  { %1655 = vmatprep.subr.bf16.mxu0 %v399_v28 }
 0x4d9   :  { %1656 = vmatpush3.bf16.msra.mxu0 %v399_v28 }
 0x4da   :  { %1669 = vmatprep.subr.bf16.mxu0 %v573_v13  ;;  %v1832_v32 = vpop.eup %1831 }
 0x4db   :  { %v1834_v33 = vpop.eup %1833  ;;  %v393_v39 = vmul.f32 %v1832_v32, %v1820_v63 }
 0x4dc   :  { %v1836_v34 = vpop.eup %1835  ;;  %v390_v40 = vmul.f32 %v1834_v33, %v2202_v60 }
 0x4dd   :  { %v561_v35 = vpop.xlane.xlu1 %560  ;;  %v392_v44 = vmul.f32 %v1836_v34, %v2198_v58 }
 0x4de   :  { %v1838_v38 = vpop.eup %1837 }
 0x4df   :  { %v391_v42 = vmul.f32 %v1838_v38, %v1822_v3  ;;  %v395_v47 = vpack.c.bf16 %v393_v39, %v392_v44 }
 0x4e1   :  { %v555_v45 = vpop.xlane.xlu1 %554  ;;  %v394_v46 = vpack.c.bf16 %v391_v42, %v390_v40 }
 0x4e3   :  { %1657 = vmatprep.mubr.msk.bf16.mxu0 %vm75_vm0, %v394_v46 }
 0x4e4   :  { %1658 = vmatmul.mubr.msk.bf16.vlgmr.msra.gmra.mrb[0].mxu0 %vm75_vm0, %v395_v47 }
 0x4e5   :  { %1670 = vmatpush3.bf16.msra.mxu0 %v573_v13  ;;  %v575_v48 = vpop.permute.xlu1 %574 }
 0x4e6   :  { %1671 = vmatprep.subr.bf16.mxu0 %v575_v48 }
 0x4e9   :  { %1672 = vmatpush3.bf16.msra.mxu0 %v575_v48  ;;  %v658_v1 = vpop.permute.xlu1 %657 }
 0x4ea   :  { %v669_v2 = vsel %vm288_vm1, %v658_v1, 0 }
 0x504   :  { %v558_v49 = vpop.xlane.xlu0 %557 }
 0x505   :  { %1839 = vrcp.f32 %v558_v49 }
 0x506   :  { %1841 = vrcp.f32 %v555_v45 }
 0x507   :  { %1843 = vrcp.f32 %v561_v35 }
 0x508   :  { %v552_v50 = vpop.xlane.xlu0 %551 }
 0x509   :  { %1845 = vrcp.f32 %v552_v50 }
 0x50c   :  { %v656_v51 = vpop.permute.xlu0 %655 }
 0x50d   :  { %1753 = vmatprep.subr.msk.bf16.mxu0 %vm288_vm1, %v656_v51  ;;  %v666_v0 = vsel %vm288_vm1, %v656_v51, 0 }
 0x50f   :  { %v1840_v52 = vpop.eup %1839 }
 0x510   :  { %v1842_v55 = vpop.eup %1841  ;;  %v568_v58 = vmul.f32 %v1840_v52, %v1828_v25 }
 0x511   :  { %v1844_v56 = vpop.eup %1843  ;;  %v567_v60 = vmul.f32 %v1842_v55, %v2212_v14 }
 0x512   :  { %v569_v61 = vmul.f32 %v1844_v56, %v2208_v7 }
 0x513   :  { %v1846_v57 = vpop.eup %1845 }
 0x514   :  { %v566_v59 = vmul.f32 %v1846_v57, %v1830_v27  ;;  %v571_v63 = vpack.c.bf16 %v569_v61, %v568_v58 }
 0x516   :  { %v570_v62 = vpack.c.bf16 %v567_v60, %v566_v59 }
 0x518   :  { %1673 = vmatprep.mubr.msk.bf16.mxu0 %vm75_vm0, %v570_v62 }
 0x519   :  { %1674 = vmatmul.mubr.msk.bf16.vlgmr.msra.gmra.mrb[4].mxu0 %vm75_vm0, %v571_v63 }
 0x51a   :  { %1678 = vmatpush3.bf16.xpose.msra.mxu0 %v666_v0  ;;  %1681 = vmatprep.mubr.msk.bf16.mxu0 %vm288_vm1, %v2153_v10 }
 0x51b   :  { %1754 = vmatprep.subr.msk.bf16.mxu0 %vm288_vm1, %v658_v1 }
 0x522   :  { %1680 = vmatpush3.bf16.xpose.msra.mxu0 %v669_v2 }
 0x529   :  { %1682 = vmatmul.mubr.msk.bf16.vlgmr.msra.gmra.mrb[8].mxu0 %vm288_vm1, %v2151_v9 }
 0x5b7   :  { %v2243_v3 = vpop.f32.mrb[0].mxu0 }
 0x5b8   :  { %v2245_v4 = vpop.f32.mrb[1].mxu0 }
 0x5b9   :  { %v2247_v5 = vpop.f32.mrb[2].mxu0 }
 0x5ba   :  { %v2249_v6 = vpop.f32.mrb[3].mxu0 }
 0x5ec   :  { %v2251_v7 = vpop.f32.mrb[4].mxu0 }
 0x5ed   :  { %v2253_v8 = vpop.f32.mrb[5].mxu0 }
 0x5ee   :  { %v2255_v14 = vpop.f32.mrb[6].mxu0 }
 0x5ef   :  { %v1774_v16 = vpack.i.bf16 %v2255_v14, %v2251_v7  ;;  %v2259_v12 = vpop.f32.mrb[7].mxu0 }
 0x5f0   :  { %v1769_v18 = vpack.i.bf16 %v2259_v12, %v2253_v8 }
 0x5fc   :  { %v1683_v19 = vpop.f32.mrb[8].mxu0 }
 0x5fd   :  { %v705_v20 = vpop.f32.mrb[9].mxu0  ;;  %v714_v26 = vadd.f32 %v1683_v19, %v2163_v15 }
 0x5fe   :  { %v706_v22 = vadd.f32 %v705_v20, %v2158_v11  ;;  %v1684_v23 = vpop.f32.mrb[10].mxu0 }
 0x5ff   :  { %v708_v25 = vpop.f32.mrb[11].mxu0  ;;  %v717_v13 = vadd.f32 %v1684_v23, %v2177_v24  ;;  %v726_v53 = vsel %vm75_vm0, %v714_v26, -inf }
 0x600   :  { %v709_v27 = vadd.f32 %v708_v25, %v2168_v17  ;;  %v720_v54 = vsel %vm75_vm0, %v706_v22, -inf }
 0x601   :  { %721 = vmax.xlane.f32.xlu0 %v720_v54  ;;  %v729_v21 = vsel %vm75_vm0, %v717_v13, -inf }
 0x602   :  { %v723_v28 = vsel %vm75_vm0, %v709_v27, -inf }
 0x603   :  { %724 = vmax.xlane.f32.xlu1 %v723_v28 }
 0x605   :  { %727 = vmax.xlane.f32.xlu0 %v726_v53 }
 0x609   :  { %730 = vmax.xlane.f32.xlu0 %v729_v21 }
 0x614   :  { %768 = vrot.lane.b32.xlu1 %v2151_v9, %s1999_s1 }
 0x68e   :  { %v722_v29 = vpop.xlane.xlu0 %721 }
 0x68f   :  { %v732_v30 = vsub.f32 %v706_v22, %v722_v29 }
 0x690   :  { %v725_v31 = vpop.xlane.xlu1 %724 }
 0x691   :  { %v736_v34 = vmul.f32 1.442695, %v732_v30  ;;  %v733_v35 = vsub.f32 %v709_v27, %v725_v31 }
 0x692   :  { %v728_v32 = vpop.xlane.xlu0 %727 }
 0x693   :  { %v734_v33 = vsub.f32 %v714_v26, %v728_v32  ;;  %v738_v42 = vmul.f32 1.442695, %v733_v35 }
 0x694   :  { %v769_v55 = vpop.permute.xlu1 %768 }
 0x695   :  { %v740_v38 = vmul.f32 1.442695, %v734_v33 }
 0x696   :  { %v731_v39 = vpop.xlane.xlu0 %730 }
 0x697   :  { %1847 = vpow2.f32 %v740_v38  ;;  %v735_v40 = vsub.f32 %v717_v13, %v731_v39 }
 0x698   :  { %1849 = vpow2.f32 %v736_v34 }
 0x699   :  { %v742_v44 = vmul.f32 1.442695, %v735_v40 }
 0x69b   :  { %1851 = vpow2.f32 %v742_v44 }
 0x69c   :  { %1853 = vpow2.f32 %v738_v42 }
 0x6a1   :  { %v1848_v45 = vpop.eup %1847 }
 0x6a2   :  { %v750_v46 = vsel %vm75_vm0, %v1848_v45, 0.0  ;;  %v1850_v47 = vpop.eup %1849 }
 0x6a3   :  { %751 = vadd.xlane.f32.xlu0 %v750_v46  ;;  %v744_v49 = vsel %vm75_vm0, %v1850_v47, 0.0 }
 0x6a5   :  { %v1852_v48 = vpop.eup %1851 }
 0x6a6   :  { %v753_v50 = vsel %vm75_vm0, %v1852_v48, 0.0  ;;  %v1854_v51 = vpop.eup %1853 }
 0x6a7   :  { %745 = vadd.xlane.f32.xlu0 %v744_v49  ;;  %754 = vadd.xlane.f32.xlu1 %v753_v50  ;;  %v747_v52 = vsel %vm75_vm0, %v1854_v51, 0.0 }
 0x6ab   :  { %748 = vadd.xlane.f32.xlu1 %v747_v52 }
 0x6bc   :  { %831 = vrot.lane.b32.xlu1 %v2153_v10, %s1997_s20 }
 0x6bd   :  { %766 = vrot.lane.b32.xlu0 %v2153_v10, %s1999_s1 }
 0x6c0   :  { %833 = vrot.lane.b32.xlu1 %v2151_v9, %s1997_s20 }
 0x6c1   :  { %827 = vrot.lane.b32.xlu0 %v2153_v10, %s1998_s21 }
 0x6c4   :  { %829 = vrot.lane.b32.xlu1 %v2151_v9, %s1998_s21 }
 0x730   :  { %v752_v56 = vpop.xlane.xlu0 %751 }
 0x734   :  { %v755_v57 = vpop.xlane.xlu1 %754  ;;  %v746_v58 = vpop.xlane.xlu0 %745 }
 0x735   :  { %1855 = vrcp.f32 %v755_v57 }
 0x736   :  { %1857 = vrcp.f32 %v746_v58 }
 0x737   :  { %1859 = vrcp.f32 %v752_v56 }
 0x738   :  { %v749_v59 = vpop.xlane.xlu1 %748  ;;  %v767_v60 = vpop.permute.xlu0 %766 }
 0x739   :  { %1861 = vrcp.f32 %v749_v59  ;;  %1685 = vmatprep.subr.bf16.mxu1 %v767_v60 }
 0x73a   :  { %1686 = vmatpush3.bf16.msra.mxu1 %v767_v60 }
 0x73b   :  { %1687 = vmatprep.subr.bf16.mxu1 %v769_v55 }
 0x73c   :  { %v832_v61 = vpop.permute.xlu1 %831  ;;  %v828_v27 = vpop.permute.xlu0 %827 }
 0x73d   :  { %v842_v26 = vsel %vm288_vm1, %v832_v61, 0 }
 0x73e   :  { %1688 = vmatpush3.bf16.msra.mxu1 %v769_v55 }
 0x73f   :  { %1755 = vmatprep.subr.msk.bf16.mxu1 %vm288_vm1, %v832_v61  ;;  %v1856_v62 = vpop.eup %1855 }
 0x740   :  { %v1858_v63 = vpop.eup %1857  ;;  %v763_v2 = vmul.f32 %v1856_v62, %v1852_v48  ;;  %v834_v54 = vpop.permute.xlu1 %833 }
 0x741   :  { %v1860_v0 = vpop.eup %1859  ;;  %v760_v19 = vmul.f32 %v1858_v63, %v1850_v47  ;;  %v845_v28 = vsel %vm288_vm1, %v834_v54, 0 }
 0x742   :  { %v762_v22 = vmul.f32 %v1860_v0, %v1848_v45 }
 0x743   :  { %v1862_v1 = vpop.eup %1861 }
 0x744   :  { %v761_v20 = vmul.f32 %v1862_v1, %v1854_v51  ;;  %v765_v25 = vpack.c.bf16 %v763_v2, %v762_v22  ;;  %v830_v13 = vpop.permute.xlu1 %829 }
 0x746   :  { %v764_v23 = vpack.c.bf16 %v761_v20, %v760_v19 }
 0x748   :  { %1689 = vmatprep.mubr.msk.bf16.mxu1 %vm75_vm0, %v764_v23 }
 0x749   :  { %1690 = vmatmul.mubr.msk.bf16.vlgmr.msra.gmra.mrb[16].mxu1 %vm75_vm0, %v765_v25 }
 0x74a   :  { %1694 = vmatpush3.bf16.xpose.msra.mxu1 %v842_v26  ;;  %1697 = vmatprep.mubr.msk.bf16.mxu1 %vm288_vm1, %v828_v27 }
 0x74b   :  { %1756 = vmatprep.subr.msk.bf16.mxu1 %vm288_vm1, %v834_v54 }
 0x752   :  { %1696 = vmatpush3.bf16.xpose.msra.mxu1 %v845_v28 }
 0x759   :  { %1698 = vmatmul.mubr.msk.bf16.vlgmr.msra.gmra.mrb[20].mxu1 %vm288_vm1, %v830_v13 }
 0x81c   :  { %v2295_v53 = vpop.f32.mrb[16].mxu1 }
 0x81d   :  { %v2297_v21 = vpop.f32.mrb[17].mxu1 }
 0x81e   :  { %v2299_v29 = vpop.f32.mrb[18].mxu1 }
 0x81f   :  { %v2301_v30 = vpop.f32.mrb[19].mxu1 }
 0x82c   :  { %v1699_v31 = vpop.f32.mrb[20].mxu1 }
 0x82d   :  { %v881_v32 = vpop.f32.mrb[21].mxu1  ;;  %v890_v38 = vadd.f32 %v1699_v31, %v2163_v15 }
 0x82e   :  { %v882_v33 = vadd.f32 %v881_v32, %v2158_v11  ;;  %v1700_v34 = vpop.f32.mrb[22].mxu1 }
 0x82f   :  { %v884_v35 = vpop.f32.mrb[23].mxu1  ;;  %v893_v44 = vadd.f32 %v1700_v34, %v2177_v24  ;;  %v902_v45 = vsel %vm75_vm0, %v890_v38, -inf }
 0x830   :  { %v885_v39 = vadd.f32 %v884_v35, %v2168_v17  ;;  %v896_v40 = vsel %vm75_vm0, %v882_v33, -inf }
 0x831   :  { %897 = vmax.xlane.f32.xlu0 %v896_v40  ;;  %v905_v46 = vsel %vm75_vm0, %v893_v44, -inf }
 0x832   :  { %v899_v42 = vsel %vm75_vm0, %v885_v39, -inf }
 0x833   :  { %900 = vmax.xlane.f32.xlu1 %v899_v42 }
 0x835   :  { %903 = vmax.xlane.f32.xlu0 %v902_v45 }
 0x839   :  { %906 = vmax.xlane.f32.xlu0 %v905_v46 }
 0x8be   :  { %v898_v11 = vpop.xlane.xlu0 %897 }
 0x8bf   :  { %v908_v47 = vsub.f32 %v882_v33, %v898_v11 }
 0x8c0   :  { %v901_v48 = vpop.xlane.xlu1 %900 }
 0x8c1   :  { %v912_v17 = vmul.f32 1.442695, %v908_v47  ;;  %v909_v50 = vsub.f32 %v885_v39, %v901_v48 }
 0x8c2   :  { %v904_v15 = vpop.xlane.xlu0 %903 }
 0x8c3   :  { %v910_v49 = vsub.f32 %v890_v38, %v904_v15  ;;  %v914_v56 = vmul.f32 1.442695, %v909_v50  ;;  %v1911_v50 = vld [vmem:[#allocation2] sm:$0xff] }
 0x8c5   :  { %v916_v51 = vmul.f32 1.442695, %v910_v49 }
 0x8c6   :  { %v907_v52 = vpop.xlane.xlu0 %906 }
 0x8c7   :  { %1863 = vpow2.f32 %v916_v51  ;;  %v911_v55 = vsub.f32 %v893_v44, %v907_v52 }
 0x8c8   :  { %1865 = vpow2.f32 %v912_v17 }
 0x8c9   :  { %v918_v24 = vmul.f32 1.442695, %v911_v55  ;;  %v1912_v55 = vld [vmem:[#allocation2 + $0x10] sm:$0xff] }
 0x8cb   :  { %1867 = vpow2.f32 %v918_v24 }
 0x8cc   :  { %1869 = vpow2.f32 %v914_v56 }
 0x8d1   :  { %v1864_v57 = vpop.eup %1863 }
 0x8d2   :  { %v926_v58 = vsel %vm75_vm0, %v1864_v57, 0.0  ;;  %v1866_v59 = vpop.eup %1865 }
 0x8d3   :  { %927 = vadd.xlane.f32.xlu0 %v926_v58  ;;  %v920_v61 = vsel %vm75_vm0, %v1866_v59, 0.0 }
 0x8d5   :  { %v1868_v60 = vpop.eup %1867 }
 0x8d6   :  { %v929_v62 = vsel %vm75_vm0, %v1868_v60, 0.0  ;;  %v1870_v63 = vpop.eup %1869 }
 0x8d7   :  { %921 = vadd.xlane.f32.xlu0 %v920_v61  ;;  %930 = vadd.xlane.f32.xlu1 %v929_v62  ;;  %v923_v0 = vsel %vm75_vm0, %v1870_v63, 0.0 }
 0x8db   :  { %924 = vadd.xlane.f32.xlu1 %v923_v0 }
 0x8ec   :  { %944 = vrot.lane.b32.xlu1 %v2151_v9, %s2000_s7 }
 0x8ed   :  { %942 = vrot.lane.b32.xlu0 %v2153_v10, %s2000_s7 }
 0x8f0   :  { %1031 = vrot.lane.b32.xlu1 %v2092_v36, %s2001_s8 }
 0x8f1   :  { %1033 = vrot.lane.b32.xlu0 %v2094_v37, %s2001_s8 }
 0x8f4   :  { %1770 = vrot.lane.b32.xlu1 %v1769_v18, %s2002_s9 }
 0x8f8   :  { %1775 = vrot.lane.b32.xlu1 %v1774_v16, %s2002_s9 }
 0x960   :  { %v928_v9 = vpop.xlane.xlu0 %927 }
 0x964   :  { %v931_v1 = vpop.xlane.xlu1 %930  ;;  %v922_v2 = vpop.xlane.xlu0 %921 }
 0x965   :  { %1871 = vrcp.f32 %v931_v1 }
 0x966   :  { %1873 = vrcp.f32 %v922_v2 }
 0x967   :  { %1875 = vrcp.f32 %v928_v9 }
 0x968   :  { %v925_v36 = vpop.xlane.xlu1 %924  ;;  %v943_v10 = vpop.permute.xlu0 %942 }
 0x969   :  { %1877 = vrcp.f32 %v925_v36  ;;  %1701 = vmatprep.subr.bf16.mxu0 %v943_v10 }
 0x96a   :  { %1702 = vmatpush3.bf16.msra.mxu0 %v943_v10 }
 0x96c   :  { %v945_v37 = vpop.permute.xlu1 %944  ;;  %v1034_v33 = vpop.permute.xlu0 %1033 }
 0x96d   :  { %1703 = vmatprep.subr.bf16.mxu0 %v945_v37 }
 0x96e   :  { %1704 = vmatpush3.bf16.msra.mxu0 %v945_v37 }
 0x96f   :  { %v1872_v8 = vpop.eup %1871 }
 0x970   :  { %v1032_v12 = vpop.permute.xlu1 %1031  ;;  %v1874_v18 = vpop.eup %1873  ;;  %v939_v16 = vmul.f32 %v1872_v8, %v1868_v60  ;;  %v1914_v60 = vld [vmem:[#allocation2 + $0x18] sm:$0xff] }
 0x971   :  { %1709 = vmatprep.subr.bf16.mxu0 %v1032_v12  ;;  %v1876_v7 = vpop.eup %1875  ;;  %v936_v20 = vmul.f32 %v1874_v18, %v1866_v59 }
 0x972   :  { %v938_v23 = vmul.f32 %v1876_v7, %v1864_v57  ;;  %v1913_v57 = vld [vmem:[#allocation2 + $0x8] sm:$0xff] }
 0x973   :  { %v1878_v14 = vpop.eup %1877 }
 0x974   :  { %v1771_v19 = vpop.permute.xlu1 %1770  ;;  %v937_v22 = vmul.f32 %v1878_v14, %v1870_v63  ;;  %v941_v13 = vpack.c.bf16 %v939_v16, %v938_v23 }
 0x975   :  { %v1773_v25 = vunpack.i.h.bf16 %v1771_v19  ;;  %v1772_v26 = vunpack.i.l.bf16 %v1771_v19 }
 0x976   :  { %v940_v27 = vpack.c.bf16 %v937_v22, %v936_v20 }
 0x977   :  { %v650_v54 = vsel %vm288_vm1, %v2249_v6, %v1773_v25  ;;  %v649_v28 = vsel %vm288_vm1, %v2245_v4, %v1772_v26 }
 0x978   :  { %v1023_v31 = vpack.c.bf16 %v650_v54, %v649_v28  ;;  %v1776_v32 = vpop.permute.xlu1 %1775  ;;  %1705 = vmatprep.mubr.msk.bf16.mxu0 %vm75_vm0, %v940_v27 }
 0x979   :  { %v1778_v34 = vunpack.i.h.bf16 %v1776_v32  ;;  %v1777_v35 = vunpack.i.l.bf16 %v1776_v32  ;;  %1706 = vmatmul.mubr.msk.bf16.vlgmr.msra.gmra.mrb[12].mxu0 %vm75_vm0, %v941_v13 }
 0x97a   :  { %1710 = vmatpush3.bf16.msra.mxu0 %v1032_v12  ;;  %1713 = vmatprep.mubr.msk.bf16.mxu0 %vm75_vm0, %v1023_v31 }
 0x97b   :  { %v652_v38 = vsel %vm288_vm1, %v2247_v5, %v1778_v34  ;;  %v651_v6 = vsel %vm288_vm1, %v2243_v3, %v1777_v35  ;;  %1711 = vmatprep.subr.bf16.mxu0 %v1034_v33  ;;  %v1029_v3 = vsub.s32 2, %v2112_v41  ;;  %v1916_v34 = vld [vmem:[#allocation2 + $0x30] sm:$0xff] }
 0x97c   :  { %v1024_v4 = vpack.c.bf16 %v652_v38, %v651_v6  ;;  %v1917_v38 = vld [vmem:[#allocation2 + $0x28] sm:$0xff] }
 0x97d   :  { %v1030_v15 = vrot.slane %v2118_v43, %v1029_v3 }
 0x97e   :  { %1712 = vmatpush3.bf16.msra.mxu0 %v1034_v33 }
 0x981   :  { %1714 = vmatmul.mubr.msk.bf16.vlgmr.msra.gmra.mrb[16].mxu0 %vm75_vm0, %v1024_v4 }
 0xa4c   :  { %v1707_v39 = vpop.f32.mrb[12].mxu0 }
 0xa4d   :  { %v988_v40 = vpop.f32.mrb[13].mxu0 }
 0xa4e   :  { %v1708_v42 = vpop.f32.mrb[14].mxu0 }
 0xa4f   :  { %v1784_v44 = vpack.i.bf16 %v1708_v42, %v1707_v39  ;;  %v991_v45 = vpop.f32.mrb[15].mxu0  ;;  %v1918_v42 = vld [vmem:[#allocation2 + $0x38] sm:$0xff] }
 0xa50   :  { %v1779_v46 = vpack.i.bf16 %v991_v45, %v988_v40 }
 0xa51   :  { %1785 = vrot.lane.b32.xlu1 %v1784_v44, %s2002_s9 }
 0xa52   :  { %1780 = vrot.lane.b32.xlu0 %v1779_v46, %s2002_s9 }
 0xa54   :  { %v1715_v11 = vpop.f32.mrb[16].mxu0 }
 0xa55   :  { %v1083_v5 = vpop.f32.mrb[17].mxu0  ;;  %v1092_v17 = vadd.f32 %v1715_v11, %v1030_v15 }
 0xa56   :  { %v1716_v47 = vpop.f32.mrb[18].mxu0  ;;  %v1084_v49 = vadd.f32 %v1083_v5, %v1030_v15 }
 0xa57   :  { %v1086_v48 = vpop.f32.mrb[19].mxu0  ;;  %v2347_v56 = vadd.f32 %v1912_v55, %v1092_v17  ;;  %v1095_v24 = vadd.f32 %v1716_v47, %v1030_v15 }
 0xa58   :  { %v2345_v51 = vadd.f32 %v1911_v50, %v1084_v49  ;;  %v1087_v52 = vadd.f32 %v1086_v48, %v1030_v15 }
 0xa59   :  { %v2353_v61 = vadd.f32 %v1914_v60, %v1095_v24  ;;  %v1128_v62 = vsel %vm75_vm0, %v2347_v56, 0.0  ;;  %v1793_v24 = vld [vmem:[#allocation5 + $0x4] ss:$8 sps:$4 sm:$0xff]  }
 0xa5a   :  { %v2349_v58 = vadd.f32 %v1913_v57, %v1087_v52  ;;  %v1122_v59 = vsel %vm75_vm0, %v2345_v51, 0.0  ;;  %1721 = vmatprep.subr.bf16.mxu1 %v1793_v24  ;;  %v1794_v57 = vld [vmem:[#allocation5 + $0x14] ss:$8 sps:$4 sm:$0xff]  }
 0xa5b   :  { %v1131_v63 = vsel %vm75_vm0, %v2353_v61, 0.0  ;;  %1722 = vmatpush3.bf16.msra.mxu1 %v1793_v24 }
 0xa5c   :  { %v1125_v43 = vsel %vm75_vm0, %v2349_v58, 0.0  ;;  %1723 = vmatprep.subr.bf16.mxu1 %v1794_v57 }
 0xa5f   :  { %1724 = vmatpush3.bf16.msra.mxu1 %v1794_v57 }
 0xa71   :  { %1123 = vadd.xlane.f32.xlu0 %v1122_v59 }
 0xa75   :  { %1126 = vadd.xlane.f32.xlu1 %v1125_v43  ;;  %1129 = vadd.xlane.f32.xlu0 %v1128_v62 }
 0xa79   :  { %1132 = vadd.xlane.f32.xlu0 %v1131_v63 }
 0xac3   :  { %v1786_v0 = vpop.permute.xlu1 %1785 }
 0xac4   :  { %v1788_v9 = vunpack.i.h.bf16 %v1786_v0  ;;  %v1787_v1 = vunpack.i.l.bf16 %v1786_v0  ;;  %v1781_v2 = vpop.permute.xlu0 %1780 }
 0xac5   :  { %v1783_v36 = vunpack.i.h.bf16 %v1781_v2  ;;  %v1782_v10 = vunpack.i.l.bf16 %v1781_v2 }
 0xac6   :  { %v1022_v37 = vsel %vm288_vm1, %v2299_v29, %v1788_v9  ;;  %v1021_v8 = vsel %vm288_vm1, %v2295_v53, %v1787_v1 }
 0xac7   :  { %v1026_v12 = vpack.c.bf16 %v1022_v37, %v1021_v8  ;;  %v1020_v18 = vsel %vm288_vm1, %v2301_v30, %v1783_v36  ;;  %v1019_v7 = vsel %vm288_vm1, %v2297_v21, %v1782_v10  ;;  %v1915_v30 = vld [vmem:[#allocation2 + $0x20] sm:$0xff] }
 0xac8   :  { %v1025_v14 = vpack.c.bf16 %v1020_v18, %v1019_v7 }
 0xaca   :  { %1717 = vmatprep.mubr.msk.bf16.mxu0 %vm75_vm0, %v1025_v14 }
 0xacb   :  { %1718 = vmatmul.mubr.msk.bf16.gmra.mrb[20].mxu0 %vm75_vm0, %v1026_v12 }
 0xafe   :  { %v1124_v16 = vpop.xlane.xlu0 %1123 }
 0xaff   :  { %v1146_v22 = vmul.f32 0.03125, %v1124_v16 }
 0xb01   :  { %v2374_v31 = vsub.f32 %v2345_v51, %v1146_v22 }
 0xb02   :  { %v1130_v19 = vpop.xlane.xlu0 %1129  ;;  %v1127_v29 = vpop.xlane.xlu1 %1126 }
 0xb03   :  { %v1147_v54 = vmul.f32 0.03125, %v1127_v29  ;;  %v1148_v33 = vmul.f32 0.03125, %v1130_v19  ;;  %v1162_v5 = vmul.f32 %v2374_v31, %v2374_v31 }
 0xb05   :  { %v2383_v39 = vsub.f32 %v2349_v58, %v1147_v54  ;;  %v2390_v46 = vsub.f32 %v2347_v56, %v1148_v33 }
 0xb06   :  { %v1133_v32 = vpop.xlane.xlu0 %1132 }
 0xb07   :  { %v1149_v40 = vmul.f32 0.03125, %v1133_v32  ;;  %v1163_v3 = vmul.f32 %v2383_v39, %v2383_v39  ;;  %v1164_v49 = vmul.f32 %v2390_v46, %v2390_v46 }
 0xb09   :  { %v2397_v47 = vsub.f32 %v2353_v61, %v1149_v40  ;;  %v1173_v17 = vsel %vm75_vm0, %v1163_v3, 0.0  ;;  %v1176_v52 = vsel %vm75_vm0, %v1164_v49, 0.0  ;;  %v1795_v3 = vld [vmem:[%s2517_s4] sm:$0xff]  }
 0xb0a   :  { %1733 = vmatprep.subr.bf16.mxu0 %v1795_v3 }
 0xb0b   :  { %v1165_v50 = vmul.f32 %v2397_v47, %v2397_v47  ;;  %1734 = vmatpush3.bf16.msra.mxu0 %v1795_v3 }
 0xb0d   :  { %v1179_v55 = vsel %vm75_vm0, %v1165_v50, 0.0 }
 0xb9e   :  { %v1719_v20 = vpop.f32.mrb[20].mxu0 }
 0xb9f   :  { %v1099_v23 = vpop.f32.mrb[21].mxu0  ;;  %v1108_v25 = vadd.f32 %v1719_v20, %v1030_v15 }
 0xba0   :  { %v1100_v53 = vadd.f32 %v1099_v23, %v1030_v15  ;;  %v1720_v26 = vpop.f32.mrb[22].mxu0 }
 0xba1   :  { %v1102_v27 = vpop.f32.mrb[23].mxu0  ;;  %v1111_v21 = vadd.f32 %v1720_v26, %v1030_v15  ;;  %v2376_v35 = vadd.f32 %v1916_v34, %v1108_v25 }
 0xba2   :  { %v2371_v28 = vadd.f32 %v1915_v30, %v1100_v53  ;;  %v1103_v13 = vadd.f32 %v1102_v27, %v1030_v15  ;;  %v1170_v15 = vsel %vm75_vm0, %v1162_v5, 0.0 }
 0xba3   :  { %v2385_v44 = vadd.f32 %v1918_v42, %v1111_v21  ;;  %v1140_v11 = vsel %vm75_vm0, %v2376_v35, 0.0 }
 0xba4   :  { %v2378_v6 = vadd.f32 %v1917_v38, %v1103_v13  ;;  %v1134_v4 = vsel %vm75_vm0, %v2371_v28, 0.0 }
 0xba5   :  { %1135 = vadd.xlane.f32.xlu0 %v1134_v4  ;;  %v1143_v48 = vsel %vm75_vm0, %v2385_v44, 0.0 }
 0xba6   :  { %v1137_v45 = vsel %vm75_vm0, %v2378_v6, 0.0 }
 0xba7   :  { %1138 = vadd.xlane.f32.xlu1 %v1137_v45 }
 0xba9   :  { %1141 = vadd.xlane.f32.xlu0 %v1140_v11 }
 0xbab   :  { %1144 = vadd.xlane.f32.xlu1 %v1143_v48 }
 0xbad   :  { %1171 = vadd.xlane.f32.xlu0 %v1170_v15 }
 0xbaf   :  { %1174 = vadd.xlane.f32.xlu1 %v1173_v17 }
 0xbb1   :  { %1177 = vadd.xlane.f32.xlu0 %v1176_v52 }
 0xbb3   :  { %1180 = vadd.xlane.f32.xlu1 %v1179_v55 }
 0xc32   :  { %v1136_v59 = vpop.xlane.xlu0 %1135 }
 0xc33   :  { %v1150_v60 = vmul.f32 0.03125, %v1136_v59 }
 0xc34   :  { %v1139_v43 = vpop.xlane.xlu1 %1138 }
 0xc35   :  { %v2412_v62 = vsub.f32 %v2371_v28, %v1150_v60  ;;  %v1151_v63 = vmul.f32 0.03125, %v1139_v43 }
 0xc36   :  { %v1142_v0 = vpop.xlane.xlu0 %1141 }
 0xc37   :  { %v2415_v9 = vsub.f32 %v2378_v6, %v1151_v63  ;;  %v1152_v1 = vmul.f32 0.03125, %v1142_v0  ;;  %v1166_v2 = vmul.f32 %v2412_v62, %v2412_v62 }
 0xc38   :  { %v1145_v36 = vpop.xlane.xlu1 %1144 }
 0xc39   :  { %v2420_v10 = vsub.f32 %v2376_v35, %v1152_v1  ;;  %v1153_v37 = vmul.f32 0.03125, %v1145_v36  ;;  %v1182_v8 = vsel %vm75_vm0, %v1166_v2, 0.0  ;;  %v1167_v12 = vmul.f32 %v2415_v9, %v2415_v9 }
 0xc3a   :  { %1183 = vadd.xlane.f32.xlu0 %v1182_v8  ;;  %v1172_v18 = vpop.xlane.xlu0 %1171 }
 0xc3b   :  { %v2426_v7 = vsub.f32 %v2385_v44, %v1153_v37  ;;  %v1194_v14 = vmul.f32 0.03125, %v1172_v18  ;;  %v1185_v16 = vsel %vm75_vm0, %v1167_v12, 0.0  ;;  %v1168_v19 = vmul.f32 %v2420_v10, %v2420_v10 }
 0xc3c   :  { %1186 = vadd.xlane.f32.xlu1 %v1185_v16  ;;  %v1175_v20 = vpop.xlane.xlu1 %1174  ;;  %v1232_v16 = vsub.s32 1, %v2112_v41 }
 0xc3d   :  { %v1202_v22 = vadd.f32 1e-12, %v1194_v14  ;;  %v1195_v29 = vmul.f32 0.03125, %v1175_v20  ;;  %v1188_v23 = vsel %vm75_vm0, %v1168_v19, 0.0  ;;  %v1169_v25 = vmul.f32 %v2426_v7, %v2426_v7 }
 0xc3e   :  { %1189 = vadd.xlane.f32.xlu0 %v1188_v23  ;;  %v1178_v53 = vpop.xlane.xlu0 %1177 }
 0xc3f   :  { %1879 = vrsqrt.f32 %v1202_v22  ;;  %v1203_v26 = vadd.f32 1e-12, %v1195_v29  ;;  %v1196_v27 = vmul.f32 0.03125, %v1178_v53  ;;  %v1191_v54 = vsel %vm75_vm0, %v1169_v25, 0.0 }
 0xc40   :  { %1192 = vadd.xlane.f32.xlu1 %v1191_v54  ;;  %v1181_v30 = vpop.xlane.xlu1 %1180 }
 0xc41   :  { %1881 = vrsqrt.f32 %v1203_v26  ;;  %v1204_v21 = vadd.f32 1e-12, %v1196_v27  ;;  %v1197_v13 = vmul.f32 0.03125, %v1181_v30 }
 0xc43   :  { %1883 = vrsqrt.f32 %v1204_v21  ;;  %v1205_v32 = vadd.f32 1e-12, %v1197_v13 }
 0xc45   :  { %1885 = vrsqrt.f32 %v1205_v32 }
 0xc49   :  { %v1880_v33 = vpop.eup %1879 }
 0xc4a   :  { %v1218_v38 = vmul.f32 %v1880_v33, %v2374_v31  ;;  %v1796_v31 = vld [vmem:[%s2517_s4 + $0x8] sm:$0xff]  }
 0xc4b   :  { %v1882_v34 = vpop.eup %1881  ;;  %1735 = vmatprep.subr.bf16.mxu0 %v1796_v31 }
 0xc4c   :  { %v1219_v4 = vmul.f32 %v1882_v34, %v2383_v39  ;;  %1736 = vmatpush3.bf16.msra.mxu0 %v1796_v31  ;;  %v1797_v39 = vld [vmem:[%s2517_s4 + $0x10] sm:$0xff]  }
 0xc4d   :  { %v1884_v40 = vpop.eup %1883  ;;  %1737 = vmatprep.subr.bf16.mxu0 %v1797_v39 }
 0xc4e   :  { %v1226_v42 = vpack.c.bf16 %v1219_v4, %v1218_v38  ;;  %v1220_v11 = vmul.f32 %v1884_v40, %v2390_v46  ;;  %v1798_v46 = vld [vmem:[%s2517_s4 + $0x18] sm:$0xff]  }
 0xc4f   :  { %v1886_v45 = vpop.eup %1885 }
 0xc50   :  { %v1221_v5 = vmul.f32 %v1886_v45, %v2397_v47  ;;  %1725 = vmatprep.mubr.msk.bf16.mxu1 %vm75_vm0, %v1226_v42  ;;  %1738 = vmatpush3.bf16.msra.mxu0 %v1797_v39 }
 0xc51   :  { %1739 = vmatprep.subr.bf16.mxu0 %v1798_v46 }
 0xc52   :  { %v1227_v48 = vpack.c.bf16 %v1221_v5, %v1220_v11 }
 0xc54   :  { %1726 = vmatmul.mubr.msk.bf16.vlgmr.msra.gmra.mrb[24].mxu1 %vm75_vm0, %v1227_v48  ;;  %1740 = vmatpush3.bf16.msra.mxu0 %v1798_v46 }
 0xcc7   :  { %v1184_v47 = vpop.xlane.xlu0 %1183 }
 0xcc8   :  { %v1198_v15 = vmul.f32 0.03125, %v1184_v47 }
 0xcc9   :  { %v1187_v49 = vpop.xlane.xlu1 %1186 }
 0xcca   :  { %v1206_v17 = vadd.f32 1e-12, %v1198_v15  ;;  %v1199_v50 = vmul.f32 0.03125, %v1187_v49 }
 0xccb   :  { %v1190_v52 = vpop.xlane.xlu0 %1189 }
 0xccc   :  { %1887 = vrsqrt.f32 %v1206_v17  ;;  %v1207_v55 = vadd.f32 1e-12, %v1199_v50  ;;  %v1200_v24 = vmul.f32 0.03125, %v1190_v52 }
 0xccd   :  { %v1193_v57 = vpop.xlane.xlu1 %1192 }
 0xcce   :  { %1889 = vrsqrt.f32 %v1207_v55  ;;  %v1208_v59 = vadd.f32 1e-12, %v1200_v24  ;;  %v1201_v60 = vmul.f32 0.03125, %v1193_v57 }
 0xcd0   :  { %1891 = vrsqrt.f32 %v1208_v59  ;;  %v1209_v43 = vadd.f32 1e-12, %v1201_v60 }
 0xcd2   :  { %1893 = vrsqrt.f32 %v1209_v43 }
 0xcd6   :  { %v1888_v63 = vpop.eup %1887 }
 0xcd7   :  { %v1222_v1 = vmul.f32 %v1888_v63, %v2412_v62  ;;  %v2463_v62 = vld [vmem:[%s2515_s2] sm:$0xf]  ;;  %s2003_s2 = smov [#allocation7]  }
 0xcd8   :  { %v1890_v0 = vpop.eup %1889  ;;  %s1522_s3 = sshll.u32 %s2003_s2, 4  ;;  %s1523_s3 = int_to_ptr.vmem [resolvable:$true] %s1522_s3 }
 0xcd9   :  { %v1223_v2 = vmul.f32 %v1890_v0, %v2415_v9  ;;  %v2466_v9 = vrot.slane %v2463_v62, %v1232_v16  ;;  %s1964_s18 = scalar_lea.vmem %s1523_s3, 1024  ;;  %p1969_p3 = scmp.lt.s32.totalorder %s1523_s3, %s1523_s3 }
 0xcda   :  { %v1892_v36 = vpop.eup %1891  ;;  %p1965_p2 = scmp.ne.s32.totalorder %s1523_s3, %s1964_s18  ;;  %p1970_p4 = scmp.lt.s32.totalorder %s1964_s18, %s1964_s18 }
 0xcdb   :  { %v1228_v37 = vpack.c.bf16 %v1223_v2, %v1222_v1  ;;  %v1224_v12 = vmul.f32 %v1892_v36, %v2420_v10 }
 0xcdc   :  { %v1894_v8 = vpop.eup %1893  ;;  %p1971_p5 = por %p1970_p4, %p1969_p3 }
 0xcdd   :  { %1729 = vmatprep.mubr.msk.bf16.mxu1 %vm75_vm0, %v1228_v37  ;;  %v1225_v18 = vmul.f32 %v1894_v8, %v2426_v7 }
 0xcde   :  { %p1972_p6 = pnand %p1971_p5, %p1965_p2 }
 0xcdf   :  { %v1229_v14 = vpack.c.bf16 %v1225_v18, %v1224_v12 }
 0xce1   :  { %1730 = vmatmul.mubr.msk.bf16.gmra.mrb[28].mxu1 %vm75_vm0, %v1229_v14 }
 0xd27   :  { %v1727_v19 = vpop.f32.mrb[24].mxu1 }
 0xd28   :  { %v1297_v20 = vadd.f32 %v1727_v19, %v2466_v9  ;;  %v1288_v22 = vpop.f32.mrb[25].mxu1 }
 0xd29   :  { %v1289_v10 = vadd.f32 %v1288_v22, %v2466_v9  ;;  %v1728_v7 = vpop.f32.mrb[26].mxu1 }
 0xd2a   :  { %v1321_v29 = vmul.f32 %v1297_v20, %v1297_v20  ;;  %v1300_v23 = vadd.f32 %v1728_v7, %v2466_v9  ;;  %v1291_v25 = vpop.f32.mrb[27].mxu1 }
 0xd2b   :  { %v1319_v53 = vmul.f32 %v1289_v10, %v1289_v10  ;;  %v1292_v26 = vadd.f32 %v1291_v25, %v2466_v9 }
 0xd2c   :  { %v1329_v27 = vmul.f32 %v1321_v29, %v1297_v20  ;;  %v1322_v54 = vmul.f32 %v1300_v23, %v1300_v23 }
 0xd2d   :  { %v1327_v30 = vmul.f32 %v1319_v53, %v1289_v10  ;;  %v1320_v21 = vmul.f32 %v1292_v26, %v1292_v26 }
 0xd2e   :  { %v1337_v13 = vmul.f32 0.044715, %v1329_v27  ;;  %v1330_v32 = vmul.f32 %v1322_v54, %v1300_v23 }
 0xd2f   :  { %v1335_v33 = vmul.f32 0.044715, %v1327_v30  ;;  %v1328_v34 = vmul.f32 %v1320_v21, %v1292_v26 }
 0xd30   :  { %v1345_v38 = vadd.f32 %v1337_v13, %v1297_v20  ;;  %v1338_v4 = vmul.f32 0.044715, %v1330_v32 }
 0xd31   :  { %v1343_v40 = vadd.f32 %v1335_v33, %v1289_v10  ;;  %v1336_v42 = vmul.f32 0.044715, %v1328_v34 }
 0xd32   :  { %v1353_v45 = vmul.f32 0.7978846, %v1345_v38  ;;  %v1346_v11 = vadd.f32 %v1338_v4, %v1300_v23 }
 0xd33   :  { %v1351_v5 = vmul.f32 0.7978846, %v1343_v40  ;;  %v1344_v48 = vadd.f32 %v1336_v42, %v1292_v26 }
 0xd34   :  { %1895 = vtanh.f32 %v1353_v45  ;;  %v1354_v3 = vmul.f32 0.7978846, %v1346_v11 }
 0xd35   :  { %1897 = vtanh.f32 %v1351_v5  ;;  %v1352_v31 = vmul.f32 0.7978846, %v1344_v48 }
 0xd36   :  { %1899 = vtanh.f32 %v1354_v3 }
 0xd37   :  { %1901 = vtanh.f32 %v1352_v31 }
 0xd3e   :  { %v1896_v39 = vpop.eup %1895 }
 0xd3f   :  { %v1898_v46 = vpop.eup %1897  ;;  %v1369_v47 = vadd.f32 1.0, %v1896_v39 }
 0xd40   :  { %v1900_v15 = vpop.eup %1899  ;;  %v1367_v49 = vadd.f32 1.0, %v1898_v46 }
 0xd41   :  { %v1902_v17 = vpop.eup %1901  ;;  %v1377_v50 = vmul.f32 0.5, %v1369_v47  ;;  %v1370_v52 = vadd.f32 1.0, %v1900_v15 }
 0xd42   :  { %v1375_v55 = vmul.f32 0.5, %v1367_v49  ;;  %v1368_v24 = vadd.f32 1.0, %v1902_v17 }
 0xd43   :  { %v1378_v57 = vmul.f32 0.5, %v1370_v52  ;;  %v1385_v60 = vmul.f32 %v1377_v50, %v1297_v20 }
 0xd44   :  { %v1376_v59 = vmul.f32 0.5, %v1368_v24  ;;  %v1383_v63 = vmul.f32 %v1375_v55, %v1289_v10 }
 0xd45   :  { %v1386_v43 = vmul.f32 %v1378_v57, %v1300_v23  ;;  %v1397_v57 = vsub.s32 3, %v2112_v41 }
 0xd46   :  { %v1384_v0 = vmul.f32 %v1376_v59, %v1292_v26 }
 0xd47   :  { %v1392_v1 = vpack.c.bf16 %v1386_v43, %v1385_v60  ;;  %v1398_v59 = vrot.slane %v2463_v62, %v1397_v57 }
 0xd48   :  { %v1391_v2 = vpack.c.bf16 %v1384_v0, %v1383_v63 }
 0xd4a   :  { %1741 = vmatprep.mubr.msk.bf16.mxu0 %vm1423_vm2, %v1391_v2 }
 0xd4b   :  { %1742 = vmatmul.mubr.msk.bf16.vlgmr.msra.gmra.mrb[24].mxu0 %vm1423_vm2, %v1392_v1 }
 0xdb4   :  { %v1731_v36 = vpop.f32.mrb[28].mxu1 }
 0xdb5   :  { %v1313_v37 = vadd.f32 %v1731_v36, %v2466_v9  ;;  %v1304_v8 = vpop.f32.mrb[29].mxu1 }
 0xdb6   :  { %v1305_v12 = vadd.f32 %v1304_v8, %v2466_v9  ;;  %v1732_v18 = vpop.f32.mrb[30].mxu1 }
 0xdb7   :  { %v1325_v14 = vmul.f32 %v1313_v37, %v1313_v37  ;;  %v1316_v16 = vadd.f32 %v1732_v18, %v2466_v9  ;;  %v1307_v19 = vpop.f32.mrb[31].mxu1 }
 0xdb8   :  { %v1323_v20 = vmul.f32 %v1305_v12, %v1305_v12  ;;  %v1308_v22 = vadd.f32 %v1307_v19, %v2466_v9 }
 0xdb9   :  { %v1333_v10 = vmul.f32 %v1325_v14, %v1313_v37  ;;  %v1326_v7 = vmul.f32 %v1316_v16, %v1316_v16 }
 0xdba   :  { %v1331_v29 = vmul.f32 %v1323_v20, %v1305_v12  ;;  %v1324_v23 = vmul.f32 %v1308_v22, %v1308_v22 }
 0xdbb   :  { %v1341_v25 = vmul.f32 0.044715, %v1333_v10  ;;  %v1334_v53 = vmul.f32 %v1326_v7, %v1316_v16 }
 0xdbc   :  { %v1339_v26 = vmul.f32 0.044715, %v1331_v29  ;;  %v1332_v27 = vmul.f32 %v1324_v23, %v1308_v22 }
 0xdbd   :  { %v1349_v54 = vadd.f32 %v1341_v25, %v1313_v37  ;;  %v1342_v30 = vmul.f32 0.044715, %v1334_v53 }
 0xdbe   :  { %v1347_v21 = vadd.f32 %v1339_v26, %v1305_v12  ;;  %v1340_v13 = vmul.f32 0.044715, %v1332_v27 }
 0xdbf   :  { %v1357_v32 = vmul.f32 0.7978846, %v1349_v54  ;;  %v1350_v33 = vadd.f32 %v1342_v30, %v1316_v16 }
 0xdc0   :  { %v1355_v34 = vmul.f32 0.7978846, %v1347_v21  ;;  %v1348_v38 = vadd.f32 %v1340_v13, %v1308_v22 }
 0xdc1   :  { %1903 = vtanh.f32 %v1357_v32  ;;  %v1358_v4 = vmul.f32 0.7978846, %v1350_v33 }
 0xdc2   :  { %1905 = vtanh.f32 %v1355_v34  ;;  %v1356_v9 = vmul.f32 0.7978846, %v1348_v38 }
 0xdc3   :  { %1907 = vtanh.f32 %v1358_v4 }
 0xdc4   :  { %1909 = vtanh.f32 %v1356_v9 }
 0xdcb   :  { %v1904_v40 = vpop.eup %1903 }
 0xdcc   :  { %v1906_v42 = vpop.eup %1905  ;;  %v1373_v45 = vadd.f32 1.0, %v1904_v40 }
 0xdcd   :  { %v1908_v11 = vpop.eup %1907  ;;  %v1371_v5 = vadd.f32 1.0, %v1906_v42 }
 0xdce   :  { %v1910_v48 = vpop.eup %1909  ;;  %v1381_v3 = vmul.f32 0.5, %v1373_v45  ;;  %v1374_v31 = vadd.f32 1.0, %v1908_v11 }
 0xdcf   :  { %v1379_v39 = vmul.f32 0.5, %v1371_v5  ;;  %v1372_v46 = vadd.f32 1.0, %v1910_v48 }
 0xdd0   :  { %v1382_v47 = vmul.f32 0.5, %v1374_v31  ;;  %v1389_v49 = vmul.f32 %v1381_v3, %v1313_v37 }
 0xdd1   :  { %v1380_v15 = vmul.f32 0.5, %v1372_v46  ;;  %v1387_v50 = vmul.f32 %v1379_v39, %v1305_v12 }
 0xdd2   :  { %v1390_v17 = vmul.f32 %v1382_v47, %v1316_v16 }
 0xdd3   :  { %v1388_v52 = vmul.f32 %v1380_v15, %v1308_v22 }
 0xdd4   :  { %v1394_v55 = vpack.c.bf16 %v1390_v17, %v1389_v49 }
 0xdd5   :  { %v1393_v24 = vpack.c.bf16 %v1388_v52, %v1387_v50 }
 0xdd7   :  { %1745 = vmatprep.mubr.msk.bf16.mxu0 %vm1423_vm2, %v1393_v24 }
 0xdd8   :  { %1746 = vmatmul.mubr.msk.bf16.gmra.mrb[28].mxu0 %vm1423_vm2, %v1394_v55 }
 0xe1e   :  { %v1743_v60 = vpop.f32.mrb[24].mxu0 }
 0xe1f   :  { %v1479_v43 = vadd.f32 %v1743_v60, %v1398_v59  ;;  %v1470_v63 = vpop.f32.mrb[25].mxu0 }
 0xe20   :  { %v1471_v0 = vadd.f32 %v1470_v63, %v1398_v59  ;;  %v1744_v1 = vpop.f32.mrb[26].mxu0 }
 0xe21   :  { %v1503_v2 = vadd.f32 %v1479_v43, %v2347_v56  ;;  %v1482_v36 = vadd.f32 %v1744_v1, %v1398_v59  ;;  %v1473_v37 = vpop.f32.mrb[27].mxu0 }
 0xe22   :  { %v1501_v8 = vadd.f32 %v1471_v0, %v2345_v51  ;;  %v1474_v12 = vadd.f32 %v1473_v37, %v1398_v59 }
 0xe23   :  { %1511 = vst.msk [vmem:[#allocation7 + $0x10] sm:$0xff] %vm75_vm0, %v1503_v2  ;;  %v1504_v18 = vadd.f32 %v1482_v36, %v2353_v61 }
 0xe24   :  { %1509 = vst.msk [vmem:[#allocation7] sm:$0xff] %vm75_vm0, %v1501_v8  ;;  %v1502_v41 = vadd.f32 %v1474_v12, %v2349_v58 }
 0xe25   :  { %1512 = vst.msk [vmem:[#allocation7 + $0x18] sm:$0xff] %vm75_vm0, %v1504_v18 }
 0xe26   :  { %1510 = vst.msk [vmem:[#allocation7 + $0x8] sm:$0xff] %vm75_vm0, %v1502_v41 }
 0xeab   :  { %v1747_v62 = vpop.f32.mrb[28].mxu0 }
 0xeac   :  { %v1495_v14 = vadd.f32 %v1747_v62, %v1398_v59  ;;  %v1486_v56 = vpop.f32.mrb[29].mxu0 }
 0xead   :  { %v1487_v16 = vadd.f32 %v1486_v56, %v1398_v59  ;;  %v1748_v19 = vpop.f32.mrb[30].mxu0 }
 0xeae   :  { %v1507_v51 = vadd.f32 %v1495_v14, %v2376_v35  ;;  %v1498_v20 = vadd.f32 %v1748_v19, %v1398_v59  ;;  %v1489_v22 = vpop.f32.mrb[31].mxu0 }
 0xeaf   :  { %v1505_v61 = vadd.f32 %v1487_v16, %v2371_v28  ;;  %v1490_v10 = vadd.f32 %v1489_v22, %v1398_v59 }
 0xeb0   :  { %1515 = vst.msk [vmem:[#allocation7 + $0x30] sm:$0xff] %vm75_vm0, %v1507_v51  ;;  %v1508_v58 = vadd.f32 %v1498_v20, %v2385_v44 }
 0xeb1   :  { %1513 = vst.msk [vmem:[#allocation7 + $0x20] sm:$0xff] %vm75_vm0, %v1505_v61  ;;  %v1506_v7 = vadd.f32 %v1490_v10, %v2378_v6 }
 0xeb2   :  { %1516 = vst.msk [vmem:[#allocation7 + $0x38] sm:$0xff] %vm75_vm0, %v1508_v58 }
 0xeb3   :  { %1514 = vst.msk [vmem:[#allocation7 + $0x28] sm:$0xff] %vm75_vm0, %v1506_v7 }
 0xeb4   :  { %1975 = shalt.err (!%p1972_p6)
}
 0xeb5   :  { %s1976_s21 = scalar_lea.hbm %s2518_s5, 1024 }
 0xeb6   :  { %p1977_p7 = scmp.ne.s32.totalorder %s2518_s5, %s1976_s21  ;;  %p1980_p8 = scmp.lt.u32.totalorder %s1976_s21, %s2518_s5 }
 0xeb8   :  { %p1982_p9 = pnand %p1980_p8, %p1977_p7 }
 0xeba   :  { %1985 = shalt.err (!%p1982_p9)
}
 0xebb   :  { %1528 = dma.vmem_to_hbm [thread:$0]  %s1523_s3, 1024, %s2518_s5, [#allocation4], %s1993_s28, %s1993_s28, %s1994_s29  }
 0xebc   :  { %1990 = dma.done.wait [#allocation4], 1024  }
 0xebd   :  { %1991 = vsyncadd [#allocation4], 4294966272 }
 0xebe   :  { %1532 = vsyncpa [#allocation3], 1 }
 0xebf   :  { %1533 = vsyncpa [#allocation6], 1 }
 0xec0   :  { %1534 = vsyncpa [#allocation4], 1 }

</bundles_post_ra>
